<compile_context>
chip_gen: v6e
topology: v6e:2x2x1
jax: 0.10.0
libtpu: 0.0.40
codegen_flags: <defaults>
</compile_context>

<pallas_src>
import jax
import jax.numpy as jnp
from jax.experimental import pallas as pl
from jax.experimental.pallas import tpu as pltpu


_HID = 200        # logical hidden width of the PyTorch module
_HID_PAD = 256    # padded hidden width (multiple of 128)
_OUT_PAD = 128    # lane-dense padded output width (y1 -> cols 0:2, y0 -> cols 2:4)


def _round_up(x, m):
    return ((x + m - 1) // m) * m


# ---------------------------------------------------------------------------
# Kernel
# ---------------------------------------------------------------------------
def _dcn_kernel(
    x_ref,
    w_s1, b_s1, w_s2, b_s2,
    w_h1, b_h1, w_h2, b_h2,
    w_o, b_o,
    out_ref,
):
    """Fused eval-mode DCN forward for one batch tile (5 MXU matmuls)."""

    def layer(v, w_ref, b_ref, relu=True):
        y = jnp.dot(v, w_ref[...], preferred_element_type=jnp.float32) + b_ref[...]
        if relu:
            # next consumer is another bf16 matmul -> keep activations bf16
            return jnp.maximum(y, 0.0).astype(jnp.bfloat16)
        return y

    h = layer(x_ref[...], w_s1, b_s1)          # [TM, 256]   shared1
    h = layer(h, w_s2, b_s2)                   # [TM, 256]   shared2
    t = layer(h, w_h1, b_h1)                   # [TM, 512]   hidden1_Y1 | hidden1_Y0
    t = layer(t, w_h2, b_h2)                   # [TM, 512]   block-diag hidden2
    out = layer(t, w_o, b_o, relu=False)       # [TM, 128]   fused heads, f32

    out_ref[...] = out.astype(out_ref.dtype)


# ---------------------------------------------------------------------------
# Wrapper
# ---------------------------------------------------------------------------
def dcn_forward(x, packed, *, tm=256):
    """Eval-mode DCN forward. x: [B, input_nodes]. Returns (y1, y0), each [B,2]."""
    B, K = x.shape
    k_pad = packed[0].shape[0]

    B8 = _round_up(B, 8)
    TM = min(tm, B8)
    Bp = _round_up(B8, TM)

    xp = jnp.zeros((Bp, k_pad), jnp.bfloat16)
    xp = xp.at[:B, :K].set(x.astype(jnp.bfloat16))

    grid = (Bp // TM,)
    x_spec = pl.BlockSpec((TM, k_pad), lambda i: (i, 0))
    # weights/biases: full-array blocks, constant index -> VMEM resident across grid
    param_specs = [pl.BlockSpec(p.shape, lambda i: (0, 0)) for p in packed]
    out_spec = pl.BlockSpec((TM, _OUT_PAD), lambda i: (i, 0))

    out = pl.pallas_call(
        _dcn_kernel,
        grid=grid,
        in_specs=[x_spec] + param_specs,
        out_specs=out_spec,
        out_shape=jax.ShapeDtypeStruct((Bp, _OUT_PAD), jnp.float32),
        compiler_params=pltpu.CompilerParams(
            dimension_semantics=("parallel",),
        ),
    )(xp, *packed)

    out = out[:B]
    return out[:, 0:2], out[:, 2:4]


# ---------------------------------------------------------------------------
# Parameter init (matches PyTorch module) + packing into the fused layout
# ---------------------------------------------------------------------------
def _xavier_uniform(key, fan_in, fan_out):
    bound = (6.0 / (fan_in + fan_out)) ** 0.5
    # stored as [in, out] (transpose of PyTorch's [out, in])
    return jax.random.uniform(
        key, (fan_in, fan_out), jnp.float32, minval=-bound, maxval=bound
    )


def _default_bias(key, fan_in, fan_out):
    # PyTorch nn.Linear default bias init: U(-1/sqrt(fan_in), 1/sqrt(fan_in)).
    bound = 1.0 / (fan_in ** 0.5)
    return jax.random.uniform(
        key, (1, fan_out), jnp.float32, minval=-bound, maxval=bound
    )


def init_dcn_params(key, input_nodes):
    dims = [
        (input_nodes, _HID),  # shared1
        (_HID, _HID),         # shared2
        (_HID, _HID),         # hidden1_Y1
        (_HID, _HID),         # hidden2_Y1
        (_HID, 2),            # out_Y1
        (_HID, _HID),         # hidden1_Y0
        (_HID, _HID),         # hidden2_Y0
        (_HID, 2),            # out_Y0
    ]
    params = []
    for (fi, fo) in dims:
        key, kw, kb = jax.random.split(key, 3)
        params.append(_xavier_uniform(kw, fi, fo))
        params.append(_default_bias(kb, fi, fo))
    return params


def pack_params(params, input_nodes):
    """Pad to MXU-friendly shapes, fuse the two towers, cast weights to bf16."""
    (w_s1, b_s1, w_s2, b_s2,
     w_h1y1, b_h1y1, w_h2y1, b_h2y1, w_oy1, b_oy1,
     w_h1y0, b_h1y0, w_h2y0, b_h2y0, w_oy0, b_oy0) = params

    H, HP = _HID, _HID_PAD
    k_pad = _round_up(input_nodes, 128)

    def pad_w(w, rows, cols):
        return jnp.zeros((rows, cols), jnp.float32).at[: w.shape[0], : w.shape[1]].set(w)

    def pad_b(b, cols):
        return jnp.zeros((1, cols), jnp.float32).at[:, : b.shape[1]].set(b)

    # shared trunk
    W_s1 = pad_w(w_s1, k_pad, HP)
    W_s2 = pad_w(w_s2, HP, HP)
    B_s1 = pad_b(b_s1, HP)
    B_s2 = pad_b(b_s2, HP)

    # fused tower layer 1: both towers consume the same shared representation
    W_h1 = jnp.concatenate([pad_w(w_h1y1, HP, HP), pad_w(w_h1y0, HP, HP)], axis=1)   # [256, 512]
    B_h1 = jnp.concatenate([pad_b(b_h1y1, HP), pad_b(b_h1y0, HP)], axis=1)           # [1, 512]

    # fused tower layer 2: block-diagonal (towers stay independent)
    Z = jnp.zeros((HP, HP), jnp.float32)
    W_h2 = jnp.block([[pad_w(w_h2y1, HP, HP), Z],
                      [Z, pad_w(w_h2y0, HP, HP)]])                                   # [512, 512]
    B_h2 = jnp.concatenate([pad_b(b_h2y1, HP), pad_b(b_h2y0, HP)], axis=1)           # [1, 512]

    # fused output heads into one lane-dense [512, 128] matrix
    W_o = jnp.zeros((2 * HP, _OUT_PAD), jnp.float32)
    W_o = W_o.at[:H, 0:2].set(w_oy1)
    W_o = W_o.at[HP:HP + H, 2:4].set(w_oy0)
    B_o = jnp.zeros((1, _OUT_PAD), jnp.float32)
    B_o = B_o.at[:, 0:2].set(b_oy1).at[:, 2:4].set(b_oy0)

    weights = [W_s1, W_s2, W_h1, W_h2, W_o]
    biases = [B_s1, B_s2, B_h1, B_h2, B_o]

    packed = []
    for w, b in zip(weights, biases):
        packed.append(w.astype(jnp.bfloat16))  # MXU operands in bf16
        packed.append(b)                       # biases stay f32
    return packed


# ---------------------------------------------------------------------------
# References
# ---------------------------------------------------------------------------
def dcn_reference_f32(x, params):
    """Module-faithful f32 eval-mode forward (unfused, unpadded)."""
    (w_s1, b_s1, w_s2, b_s2,
     w_h1y1, b_h1y1, w_h2y1, b_h2y1, w_oy1, b_oy1,
     w_h1y0, b_h1y0, w_h2y0, b_h2y0, w_oy0, b_oy0) = params
    h = jnp.maximum(x @ w_s1 + b_s1, 0.0)
    h = jnp.maximum(h @ w_s2 + b_s2, 0.0)
    y1 = jnp.maximum(h @ w_h1y1 + b_h1y1, 0.0)
    y1 = jnp.maximum(y1 @ w_h2y1 + b_h2y1, 0.0)
    y1 = y1 @ w_oy1 + b_oy1
    y0 = jnp.maximum(h @ w_h1y0 + b_h1y0, 0.0)
    y0 = jnp.maximum(y0 @ w_h2y0 + b_h2y0, 0.0)
    y0 = y0 @ w_oy0 + b_oy0
    return y1, y0


def dcn_reference_packed(x, packed):
    """Pure-JAX mirror of the kernel math on the same fused bf16 params."""
    (W_s1, B_s1, W_s2, B_s2, W_h1, B_h1, W_h2, B_h2, W_o, B_o) = packed
    B, K = x.shape
    k_pad = W_s1.shape[0]
    xp = jnp.zeros((B, k_pad), jnp.bfloat16).at[:, :K].set(x.astype(jnp.bfloat16))

    def layer(v, w, b, relu=True):
        y = jnp.dot(v, w, preferred_element_type=jnp.float32) + b
        if relu:
            return jnp.maximum(y, 0.0).astype(jnp.bfloat16)
        return y

    h = layer(xp, W_s1, B_s1)
    h = layer(h, W_s2, B_s2)
    t = layer(h, W_h1, B_h1)
    t = layer(t, W_h2, B_h2)
    out = layer(t, W_o, B_o, relu=False)
    return out[:, 0:2], out[:, 2:4]


# ---------------------------------------------------------------------------
if __name__ == "__main__":
    B = 8
    INPUT_NODES = 32

    key = jax.random.PRNGKey(0)
    key, kx, kp = jax.random.split(key, 3)
    x = jax.random.normal(kx, (B, INPUT_NODES), jnp.float32)
    params = init_dcn_params(kp, INPUT_NODES)
    packed = pack_params(params, INPUT_NODES)
    # ps_score only affects the training path (not implemented); unused here.

    y1, y0 = dcn_forward(x, packed)
    jax.block_until_ready((y1, y0))

    assert y1.shape == (B, 2) and y0.shape == (B, 2)

    # Tight check against a pure-JAX model using the identical fused bf16 params.
    r1b, r0b = dcn_reference_packed(x, packed)
    assert jnp.allclose(y1, r1b, atol=1e-3, rtol=1e-3)
    assert jnp.allclose(y0, r0b, atol=1e-3, rtol=1e-3)

    # Looser sanity check against the module-faithful f32 forward
    # (catches packing/fusion mistakes; tolerance absorbs bf16 rounding).
    r1, r0 = dcn_reference_f32(x, params)
    assert jnp.allclose(y1, r1, atol=1e-1, rtol=1e-1)
    assert jnp.allclose(y0, r0, atol=1e-1, rtol=1e-1)

    print("KERNEL_OK")
</pallas_src>

<mosaic_0001>
module attributes {stable_mosaic.version = 11 : i64} {
  func.func @_dcn_kernel(%arg0: i32, %arg1: memref<8x128xbf16, #tpu.memory_space<vmem>>, %arg2: memref<128x256xbf16, #tpu.memory_space<vmem>>, %arg3: memref<1x256xf32, #tpu.memory_space<vmem>>, %arg4: memref<256x256xbf16, #tpu.memory_space<vmem>>, %arg5: memref<1x256xf32, #tpu.memory_space<vmem>>, %arg6: memref<256x512xbf16, #tpu.memory_space<vmem>>, %arg7: memref<1x512xf32, #tpu.memory_space<vmem>>, %arg8: memref<512x512xbf16, #tpu.memory_space<vmem>>, %arg9: memref<1x512xf32, #tpu.memory_space<vmem>>, %arg10: memref<512x128xbf16, #tpu.memory_space<vmem>>, %arg11: memref<1x128xf32, #tpu.memory_space<vmem>>, %arg12: memref<8x128xf32, #tpu.memory_space<vmem>>) attributes {dimension_semantics = [#tpu.dimension_semantics<parallel>], iteration_bounds = array<i64: 1>, scalar_prefetch = 0 : i64, scratch_operands = 0 : i64, tpu.core_type = #tpu.core_type<tc>, window_params = [{transform_indices = @transform_0, window_bounds = array<i64: 8, 128>}, {pipeline_mode = #tpu.pipeline_mode<synchronous>, transform_indices = @transform_1, window_bounds = array<i64: 128, 256>}, {pipeline_mode = #tpu.pipeline_mode<synchronous>, transform_indices = @transform_2, window_bounds = array<i64: 1, 256>}, {pipeline_mode = #tpu.pipeline_mode<synchronous>, transform_indices = @transform_3, window_bounds = array<i64: 256, 256>}, {pipeline_mode = #tpu.pipeline_mode<synchronous>, transform_indices = @transform_4, window_bounds = array<i64: 1, 256>}, {pipeline_mode = #tpu.pipeline_mode<synchronous>, transform_indices = @transform_5, window_bounds = array<i64: 256, 512>}, {pipeline_mode = #tpu.pipeline_mode<synchronous>, transform_indices = @transform_6, window_bounds = array<i64: 1, 512>}, {pipeline_mode = #tpu.pipeline_mode<synchronous>, transform_indices = @transform_7, window_bounds = array<i64: 512, 512>}, {pipeline_mode = #tpu.pipeline_mode<synchronous>, transform_indices = @transform_8, window_bounds = array<i64: 1, 512>}, {pipeline_mode = #tpu.pipeline_mode<synchronous>, transform_indices = @transform_9, window_bounds = array<i64: 512, 128>}, {pipeline_mode = #tpu.pipeline_mode<synchronous>, transform_indices = @transform_10, window_bounds = array<i64: 1, 128>}, {transform_indices = @transform_11, window_bounds = array<i64: 8, 128>}]} {
    %c0 = arith.constant 0 : index
    %c0_0 = arith.constant 0 : index
    %0 = vector.load %arg1[%c0, %c0_0] : memref<8x128xbf16, #tpu.memory_space<vmem>>, vector<8x128xbf16>
    %c0_1 = arith.constant 0 : index
    %c0_2 = arith.constant 0 : index
    %1 = vector.load %arg2[%c0_1, %c0_2] : memref<128x256xbf16, #tpu.memory_space<vmem>>, vector<128x256xbf16>
    %cst = arith.constant dense<0.000000e+00> : vector<8x256xf32>
    %2 = tpu.matmul %0, %1, %cst {dimension_numbers = #tpu.dot_dimension_numbers<[1], [0], [0], [1], [0, 0, 1, 1], [], []>} : vector<8x128xbf16>, vector<128x256xbf16>, vector<8x256xf32> -> vector<8x256xf32>
    %c0_3 = arith.constant 0 : index
    %c0_4 = arith.constant 0 : index
    %3 = vector.load %arg3[%c0_3, %c0_4] : memref<1x256xf32, #tpu.memory_space<vmem>>, vector<1x256xf32>
    %4 = vector.broadcast %3 : vector<1x256xf32> to vector<8x256xf32>
    %5 = arith.addf %2, %4 : vector<8x256xf32>
    %cst_5 = arith.constant 0.000000e+00 : f32
    %6 = vector.broadcast %cst_5 : f32 to vector<8x256xf32>
    %7 = arith.maximumf %5, %6 : vector<8x256xf32>
    %8 = arith.truncf %7 : vector<8x256xf32> to vector<8x256xbf16>
    %c0_6 = arith.constant 0 : index
    %c0_7 = arith.constant 0 : index
    %9 = vector.load %arg4[%c0_6, %c0_7] : memref<256x256xbf16, #tpu.memory_space<vmem>>, vector<256x256xbf16>
    %cst_8 = arith.constant dense<0.000000e+00> : vector<8x256xf32>
    %10 = tpu.matmul %8, %9, %cst_8 {dimension_numbers = #tpu.dot_dimension_numbers<[1], [0], [0], [1], [0, 0, 1, 1], [], []>} : vector<8x256xbf16>, vector<256x256xbf16>, vector<8x256xf32> -> vector<8x256xf32>
    %c0_9 = arith.constant 0 : index
    %c0_10 = arith.constant 0 : index
    %11 = vector.load %arg5[%c0_9, %c0_10] : memref<1x256xf32, #tpu.memory_space<vmem>>, vector<1x256xf32>
    %12 = vector.broadcast %11 : vector<1x256xf32> to vector<8x256xf32>
    %13 = arith.addf %10, %12 : vector<8x256xf32>
    %cst_11 = arith.constant 0.000000e+00 : f32
    %14 = vector.broadcast %cst_11 : f32 to vector<8x256xf32>
    %15 = arith.maximumf %13, %14 : vector<8x256xf32>
    %16 = arith.truncf %15 : vector<8x256xf32> to vector<8x256xbf16>
    %c0_12 = arith.constant 0 : index
    %c0_13 = arith.constant 0 : index
    %17 = vector.load %arg6[%c0_12, %c0_13] : memref<256x512xbf16, #tpu.memory_space<vmem>>, vector<256x512xbf16>
    %cst_14 = arith.constant dense<0.000000e+00> : vector<8x512xf32>
    %18 = tpu.matmul %16, %17, %cst_14 {dimension_numbers = #tpu.dot_dimension_numbers<[1], [0], [0], [1], [0, 0, 1, 1], [], []>} : vector<8x256xbf16>, vector<256x512xbf16>, vector<8x512xf32> -> vector<8x512xf32>
    %c0_15 = arith.constant 0 : index
    %c0_16 = arith.constant 0 : index
    %19 = vector.load %arg7[%c0_15, %c0_16] : memref<1x512xf32, #tpu.memory_space<vmem>>, vector<1x512xf32>
    %20 = vector.broadcast %19 : vector<1x512xf32> to vector<8x512xf32>
    %21 = arith.addf %18, %20 : vector<8x512xf32>
    %cst_17 = arith.constant 0.000000e+00 : f32
    %22 = vector.broadcast %cst_17 : f32 to vector<8x512xf32>
    %23 = arith.maximumf %21, %22 : vector<8x512xf32>
    %24 = arith.truncf %23 : vector<8x512xf32> to vector<8x512xbf16>
    %c0_18 = arith.constant 0 : index
    %c0_19 = arith.constant 0 : index
    %25 = vector.load %arg8[%c0_18, %c0_19] : memref<512x512xbf16, #tpu.memory_space<vmem>>, vector<512x512xbf16>
    %cst_20 = arith.constant dense<0.000000e+00> : vector<8x512xf32>
    %26 = tpu.matmul %24, %25, %cst_20 {dimension_numbers = #tpu.dot_dimension_numbers<[1], [0], [0], [1], [0, 0, 1, 1], [], []>} : vector<8x512xbf16>, vector<512x512xbf16>, vector<8x512xf32> -> vector<8x512xf32>
    %c0_21 = arith.constant 0 : index
    %c0_22 = arith.constant 0 : index
    %27 = vector.load %arg9[%c0_21, %c0_22] : memref<1x512xf32, #tpu.memory_space<vmem>>, vector<1x512xf32>
    %28 = vector.broadcast %27 : vector<1x512xf32> to vector<8x512xf32>
    %29 = arith.addf %26, %28 : vector<8x512xf32>
    %cst_23 = arith.constant 0.000000e+00 : f32
    %30 = vector.broadcast %cst_23 : f32 to vector<8x512xf32>
    %31 = arith.maximumf %29, %30 : vector<8x512xf32>
    %32 = arith.truncf %31 : vector<8x512xf32> to vector<8x512xbf16>
    %c0_24 = arith.constant 0 : index
    %c0_25 = arith.constant 0 : index
    %33 = vector.load %arg10[%c0_24, %c0_25] : memref<512x128xbf16, #tpu.memory_space<vmem>>, vector<512x128xbf16>
    %cst_26 = arith.constant dense<0.000000e+00> : vector<8x128xf32>
    %34 = tpu.matmul %32, %33, %cst_26 {dimension_numbers = #tpu.dot_dimension_numbers<[1], [0], [0], [1], [0, 0, 1, 1], [], []>} : vector<8x512xbf16>, vector<512x128xbf16>, vector<8x128xf32> -> vector<8x128xf32>
    %c0_27 = arith.constant 0 : index
    %c0_28 = arith.constant 0 : index
    %35 = vector.load %arg11[%c0_27, %c0_28] : memref<1x128xf32, #tpu.memory_space<vmem>>, vector<1x128xf32>
    %36 = vector.broadcast %35 : vector<1x128xf32> to vector<8x128xf32>
    %37 = arith.addf %34, %36 : vector<8x128xf32>
    %c0_29 = arith.constant 0 : index
    %c0_30 = arith.constant 0 : index
    %38 = vector.load %arg12[%c0_29, %c0_30] : memref<8x128xf32, #tpu.memory_space<vmem>>, vector<8x128xf32>
    tpu.vector_store %arg12[%c0_29, %c0_30], %37 {strides = array<i32>} : memref<8x128xf32, #tpu.memory_space<vmem>>, vector<8x128xf32>,
    return
  }
  func.func @transform_0(%arg0: i32) -> (i32, i32) {
    %c0_i32 = arith.constant 0 : i32
    %c0_i32_0 = arith.constant 0 : i32
    return %arg0, %c0_i32 : i32, i32
  }
  func.func @transform_1(%arg0: i32) -> (i32, i32) {
    %c0_i32 = arith.constant 0 : i32
    %c0_i32_0 = arith.constant 0 : i32
    %c0_i32_1 = arith.constant 0 : i32
    return %c0_i32, %c0_i32_0 : i32, i32
  }
  func.func @transform_2(%arg0: i32) -> (i32, i32) {
    %c0_i32 = arith.constant 0 : i32
    %c0_i32_0 = arith.constant 0 : i32
    %c0_i32_1 = arith.constant 0 : i32
    return %c0_i32, %c0_i32_0 : i32, i32
  }
  func.func @transform_3(%arg0: i32) -> (i32, i32) {
    %c0_i32 = arith.constant 0 : i32
    %c0_i32_0 = arith.constant 0 : i32
    %c0_i32_1 = arith.constant 0 : i32
    return %c0_i32, %c0_i32_0 : i32, i32
  }
  func.func @transform_4(%arg0: i32) -> (i32, i32) {
    %c0_i32 = arith.constant 0 : i32
    %c0_i32_0 = arith.constant 0 : i32
    %c0_i32_1 = arith.constant 0 : i32
    return %c0_i32, %c0_i32_0 : i32, i32
  }
  func.func @transform_5(%arg0: i32) -> (i32, i32) {
    %c0_i32 = arith.constant 0 : i32
    %c0_i32_0 = arith.constant 0 : i32
    %c0_i32_1 = arith.constant 0 : i32
    return %c0_i32, %c0_i32_0 : i32, i32
  }
  func.func @transform_6(%arg0: i32) -> (i32, i32) {
    %c0_i32 = arith.constant 0 : i32
    %c0_i32_0 = arith.constant 0 : i32
    %c0_i32_1 = arith.constant 0 : i32
    return %c0_i32, %c0_i32_0 : i32, i32
  }
  func.func @transform_7(%arg0: i32) -> (i32, i32) {
    %c0_i32 = arith.constant 0 : i32
    %c0_i32_0 = arith.constant 0 : i32
    %c0_i32_1 = arith.constant 0 : i32
    return %c0_i32, %c0_i32_0 : i32, i32
  }
  func.func @transform_8(%arg0: i32) -> (i32, i32) {
    %c0_i32 = arith.constant 0 : i32
    %c0_i32_0 = arith.constant 0 : i32
    %c0_i32_1 = arith.constant 0 : i32
    return %c0_i32, %c0_i32_0 : i32, i32
  }
  func.func @transform_9(%arg0: i32) -> (i32, i32) {
    %c0_i32 = arith.constant 0 : i32
    %c0_i32_0 = arith.constant 0 : i32
    %c0_i32_1 = arith.constant 0 : i32
    return %c0_i32, %c0_i32_0 : i32, i32
  }
  func.func @transform_10(%arg0: i32) -> (i32, i32) {
    %c0_i32 = arith.constant 0 : i32
    %c0_i32_0 = arith.constant 0 : i32
    %c0_i32_1 = arith.constant 0 : i32
    return %c0_i32, %c0_i32_0 : i32, i32
  }
  func.func @transform_11(%arg0: i32) -> (i32, i32) {
    %c0_i32 = arith.constant 0 : i32
    %c0_i32_0 = arith.constant 0 : i32
    return %arg0, %c0_i32 : i32, i32
  }
}

</mosaic_0001>

<bundles_post_ra>
// kernel: tpu_custom_call.1
= control target key start
LH: loop header
LB: loop body
LE: loop exit
PB: predicated region body
PF: predicated region fallthrough
CT: control target
= control target key end

     0   :  { %16 = vsyncpa [#allocation3], 0  ;;  %s3436_s0 = inlined_call_operand.hbm [shape: bf16[8,128], index: 0, kind: input, shape index: {}]   ;;  %s3437_s1 = inlined_call_operand.hbm [shape: bf16[128,256], index: 1, kind: input, shape index: {}]   ;;  %s3438_s2 = inlined_call_operand.hbm [shape: f32[1,256], index: 2, kind: input, shape index: {}]   ;;  %s3439_s3 = inlined_call_operand.hbm [shape: bf16[256,256], index: 3, kind: input, shape index: {}]   ;;  %s3440_s4 = inlined_call_operand.hbm [shape: f32[1,256], index: 4, kind: input, shape index: {}]   ;;  %s3441_s5 = inlined_call_operand.hbm [shape: bf16[256,512], index: 5, kind: input, shape index: {}]   ;;  %s3442_s6 = inlined_call_operand.vmem [shape: f32[1,512], index: 6, kind: input, shape index: {}]   ;;  %s3443_s7 = inlined_call_operand.hbm [shape: bf16[512,512], index: 7, kind: input, shape index: {}]   ;;  %s3444_s8 = inlined_call_operand.vmem [shape: f32[1,512], index: 8, kind: input, shape index: {}]   ;;  %s3445_s9 = inlined_call_operand.hbm [shape: bf16[512,128], index: 9, kind: input, shape index: {}]   ;;  %s3446_s10 = inlined_call_operand.vmem [shape: f32[1,128], index: 10, kind: input, shape index: {}]   ;;  %s3447_s11 = inlined_call_operand.hbm [shape: f32[8,128], index: 11, kind: output, shape index: {}]  }
   0x1   :  { %17 = vsyncpa [#allocation6], 0 }
   0x2   :  { %18 = vsyncpa [#allocation9], 0 }
   0x3   :  { %19 = vsyncpa [#allocation12], 0 }
   0x4   :  { %20 = vsyncpa [#allocation15], 0 }
   0x5   :  { %21 = vsyncpa [#allocation4], 0  ;;  %s3284_s17 = smov [#allocation5]  }
   0x6   :  { %s37_s18 = sshll.u32 %s3284_s17, 4  ;;  %s38_s18 = int_to_ptr.vmem [resolvable:$true] %s37_s18 }
   0x7   :  { %s3100_s19 = scalar_lea.vmem %s38_s18, 2048  ;;  %p3105_p1 = scmp.lt.s32.totalorder %s38_s18, %s38_s18 }
   0x8   :  { %p3101_p0 = scmp.ne.s32.totalorder %s38_s18, %s3100_s19  ;;  %p3106_p2 = scmp.lt.s32.totalorder %s3100_s19, %s3100_s19 }
   0xa   :  { %p3107_p3 = por %p3106_p2, %p3105_p1 }
   0xc   :  { %p3108_p4 = pnand %p3107_p3, %p3101_p0 }
   0xe   :  { %3111 = shalt.err (!%p3108_p4)
}
   0xf   :  { %s3285_s20 = smov 128   ;;  %s3286_s21 = smov 8  }
  0x10   :  { %43 = dma.hbm_to_vmem [thread:$0]  %s3437_s1, 2048, %s38_s18, [#allocation6], %s3285_s20, %s3285_s20, %s3286_s21  }
  0x11   :  { %s3287_s24 = smov [#allocation8]   ;;  %s3288_s26 = smov [#allocation11]  }
  0x12   :  { %s59_s25 = sshll.u32 %s3287_s24, 4  ;;  %s81_s27 = sshll.u32 %s3288_s26, 4  ;;  %s60_s25 = int_to_ptr.vmem [resolvable:$true] %s59_s25  ;;  %s82_s27 = int_to_ptr.vmem [resolvable:$true] %s81_s27 }
  0x13   :  { %s3120_s28 = scalar_lea.vmem %s60_s25, 4096  ;;  %p3125_p6 = scmp.lt.s32.totalorder %s60_s25, %s60_s25 }
  0x14   :  { %p3121_p5 = scmp.ne.s32.totalorder %s60_s25, %s3120_s28  ;;  %p3126_p7 = scmp.lt.s32.totalorder %s3120_s28, %s3120_s28 }
  0x16   :  { %p3127_p8 = por %p3126_p7, %p3125_p6 }
  0x18   :  { %p3128_p9 = pnand %p3127_p8, %p3121_p5 }
  0x1a   :  { %3131 = shalt.err (!%p3128_p9)
}
  0x1b   :  { %65 = dma.hbm_to_vmem [thread:$0]  %s3439_s3, 4096, %s60_s25, [#allocation9], %s3285_s20, %s3285_s20, %s3286_s21  }
  0x1c   :  { %s3140_s12 = scalar_lea.vmem %s82_s27, 8192  ;;  %p3145_p11 = scmp.lt.s32.totalorder %s82_s27, %s82_s27 }
  0x1d   :  { %p3141_p10 = scmp.ne.s32.totalorder %s82_s27, %s3140_s12  ;;  %p3146_p12 = scmp.lt.s32.totalorder %s3140_s12, %s3140_s12 }
  0x1f   :  { %p3147_p13 = por %p3146_p12, %p3145_p11 }
  0x21   :  { %p3148_p0 = pnand %p3147_p13, %p3141_p10 }
  0x23   :  { %3151 = shalt.err (!%p3148_p0)
}
  0x24   :  { %s3289_s1 = smov 256   ;;  %s3290_s13 = smov 16  }
  0x25   :  { %87 = dma.hbm_to_vmem [thread:$0]  %s3441_s5, 8192, %s82_s27, [#allocation12], %s3289_s1, %s3289_s1, %s3290_s13  }
  0x26   :  { %s3291_s16 = smov [#allocation2]   ;;  %s3292_s3 = smov [#allocation7]  }
  0x27   :  { %s28_s17 = sshll.u32 %s3291_s16, 4  ;;  %s50_s18 = sshll.u32 %s3292_s3, 4  ;;  %s29_s17 = int_to_ptr.vmem [resolvable:$true] %s28_s17  ;;  %s51_s18 = int_to_ptr.vmem [resolvable:$true] %s50_s18 }
  0x28   :  { %s3160_s19 = scalar_lea.vmem %s29_s17, 64  ;;  %p3165_p2 = scmp.lt.s32.totalorder %s29_s17, %s29_s17 }
  0x29   :  { %p3161_p1 = scmp.ne.s32.totalorder %s29_s17, %s3160_s19  ;;  %p3166_p3 = scmp.lt.s32.totalorder %s3160_s19, %s3160_s19 }
  0x2b   :  { %p3167_p4 = por %p3166_p3, %p3165_p2 }
  0x2d   :  { %p3168_p5 = pnand %p3167_p4, %p3161_p1 }
  0x2f   :  { %3171 = shalt.err (!%p3168_p5)
}
  0x30   :  { %31 = dma.hbm_to_vmem [thread:$0]  %s3436_s0, 64, %s29_s17, [#allocation3]  }
  0x31   :  { %s3180_s22 = scalar_lea.vmem %s51_s18, 32  ;;  %p3185_p7 = scmp.lt.s32.totalorder %s51_s18, %s51_s18 }
  0x32   :  { %p3181_p6 = scmp.ne.s32.totalorder %s51_s18, %s3180_s22  ;;  %p3186_p8 = scmp.lt.s32.totalorder %s3180_s22, %s3180_s22 }
  0x34   :  { %p3187_p9 = por %p3186_p8, %p3185_p7 }
  0x36   :  { %p3188_p10 = pnand %p3187_p9, %p3181_p6 }
  0x38   :  { %3191 = shalt.err (!%p3188_p10)
}
  0x39   :  { %53 = dma.hbm_to_vmem [thread:$0]  %s3438_s2, 32, %s51_s18, [#allocation6]  }
  0x3a   :  { %s3293_s24 = smov [#allocation10]   ;;  %s3294_s26 = smov [#allocation13]  }
  0x3b   :  { %s72_s25 = sshll.u32 %s3293_s24, 4  ;;  %s95_s27 = sshll.u32 %s3294_s26, 4  ;;  %s73_s25 = int_to_ptr.vmem [resolvable:$true] %s72_s25  ;;  %s96_s27 = int_to_ptr.vmem [resolvable:$true] %s95_s27 }
  0x3c   :  { %s3200_s28 = scalar_lea.vmem %s73_s25, 32  ;;  %p3205_p12 = scmp.lt.s32.totalorder %s73_s25, %s73_s25 }
  0x3d   :  { %p3201_p11 = scmp.ne.s32.totalorder %s73_s25, %s3200_s28  ;;  %p3206_p13 = scmp.lt.s32.totalorder %s3200_s28, %s3200_s28 }
  0x3f   :  { %p3207_p0 = por %p3206_p13, %p3205_p12 }
  0x41   :  { %p3208_p1 = pnand %p3207_p0, %p3201_p11 }
  0x43   :  { %3211 = shalt.err (!%p3208_p1)
}
  0x44   :  { %75 = dma.hbm_to_vmem [thread:$0]  %s3440_s4, 32, %s73_s25, [#allocation9]  }
  0x45   :  { %s3220_s30 = scalar_lea.vmem %s96_s27, 16384  ;;  %p3225_p3 = scmp.lt.s32.totalorder %s96_s27, %s96_s27 }
  0x46   :  { %p3221_p2 = scmp.ne.s32.totalorder %s96_s27, %s3220_s30  ;;  %p3226_p4 = scmp.lt.s32.totalorder %s3220_s30, %s3220_s30 }
  0x48   :  { %p3227_p5 = por %p3226_p4, %p3225_p3 }
  0x4a   :  { %p3228_p6 = pnand %p3227_p5, %p3221_p2 }
  0x4c   :  { %3231 = shalt.err (!%p3228_p6)
}
  0x4d   :  { %101 = dma.hbm_to_vmem [thread:$0]  %s3443_s7, 16384, %s96_s27, [#allocation12], %s3289_s1, %s3289_s1, %s3290_s13  }
  0x4e   :  { %s3295_s14 = smov [#allocation14]  }
  0x4f   :  { %s109_s15 = sshll.u32 %s3295_s14, 4  ;;  %s110_s15 = int_to_ptr.vmem [resolvable:$true] %s109_s15 }
  0x50   :  { %s3240_s16 = scalar_lea.vmem %s110_s15, 4096  ;;  %p3245_p8 = scmp.lt.s32.totalorder %s110_s15, %s110_s15 }
  0x51   :  { %p3241_p7 = scmp.ne.s32.totalorder %s110_s15, %s3240_s16  ;;  %p3246_p9 = scmp.lt.s32.totalorder %s3240_s16, %s3240_s16 }
  0x53   :  { %p3247_p10 = por %p3246_p9, %p3245_p8 }
  0x55   :  { %p3248_p11 = pnand %p3247_p10, %p3241_p7 }
  0x57   :  { %3251 = shalt.err (!%p3248_p11)
}
  0x58   :  { %s3296_s4 = smov 64   ;;  %s3297_s17 = smov 4  }
  0x59   :  { %115 = dma.hbm_to_vmem [thread:$0]  %s3445_s9, 4096, %s110_s15, [#allocation15], %s3296_s4, %s3296_s4, %s3297_s17  }
  0x5a   :  { %3272 = dma.done.wait [#allocation3], 64  }
  0x5b   :  { %3273 = vsyncadd [#allocation3], 4294967232 }
  0x5c   :  { %3274 = dma.done.wait [#allocation6], 2080  }
  0x5d   :  { %3275 = vsyncadd [#allocation6], 4294965216 }
  0x5e   :  { %3276 = dma.done.wait [#allocation9], 4128  }
  0x5f   :  { %3277 = vsyncadd [#allocation9], 4294963168 }
  0x60   :  { %3278 = dma.done.wait [#allocation12], 24576  }
  0x61   :  { %3279 = vsyncadd [#allocation12], 4294942720 }
  0x62   :  { %3280 = dma.done.wait [#allocation15], 4096  }
  0x63   :  { %3281 = vsyncadd [#allocation15], 4294963200  ;;  %v3298_v0 = vmov 0   ;;  %v2700_v1 = vld [vmem:[#allocation5 + $0x74] ss:$8 sps:$4 sm:$0xff]   ;;  %s3299_s19 = smov [#allocation16]  }
  0x64   :  { %284 = vmatprep.mubr.bf16.mxu0 %v3298_v0  ;;  %v2702_v2 = vld [vmem:[#allocation5 + $0x70] ss:$8 sps:$4 sm:$0xff]   ;;  %252 = vmatprep.subr.bf16.mxu0 %v2700_v1  ;;  %v2703_v3 = vld [vmem:[#allocation5 + $0x64] ss:$8 sps:$4 sm:$0xff]   ;;  %v2705_v4 = vld [vmem:[#allocation5 + $0x60] ss:$8 sps:$4 sm:$0xff]  }
  0x65   :  { %253 = vmatpush1.bf16.msra.mxu0 %v2702_v2  ;;  %v2706_v5 = vld [vmem:[#allocation5 + $0x54] ss:$8 sps:$4 sm:$0xff]   ;;  %v2708_v6 = vld [vmem:[#allocation5 + $0x50] ss:$8 sps:$4 sm:$0xff]   ;;  %v2709_v7 = vld [vmem:[#allocation5 + $0x44] ss:$8 sps:$4 sm:$0xff]  }
  0x66   :  { %254 = vmatprep.subr.bf16.mxu0 %v2703_v3  ;;  %v2711_v8 = vld [vmem:[#allocation5 + $0x40] ss:$8 sps:$4 sm:$0xff]   ;;  %v2712_v9 = vld [vmem:[#allocation5 + $0x34] ss:$8 sps:$4 sm:$0xff]   ;;  %v2714_v13 = vld [vmem:[#allocation5 + $0x30] ss:$8 sps:$4 sm:$0xff]  }
  0x67   :  { %v2724_v10 = vld [vmem:[#allocation8 + $0x74] ss:$8 sps:$4 sm:$0xff]   ;;  %v2726_v11 = vld [vmem:[#allocation8 + $0x70] ss:$8 sps:$4 sm:$0xff]   ;;  %v2727_v12 = vld [vmem:[#allocation8 + $0x64] ss:$8 sps:$4 sm:$0xff]  }
  0x68   :  { %501 = vmatprep.subr.bf16.mxu1 %v2724_v10  ;;  %v2729_v14 = vld [vmem:[#allocation8 + $0x60] ss:$8 sps:$4 sm:$0xff]   ;;  %v2730_v15 = vld [vmem:[#allocation8 + $0x54] ss:$8 sps:$4 sm:$0xff]   ;;  %v2732_v18 = vld [vmem:[#allocation8 + $0x50] ss:$8 sps:$4 sm:$0xff]  }
  0x69   :  { %255 = vmatpush1.bf16.msra.mxu0 %v2705_v4  ;;  %502 = vmatpush1.bf16.msra.mxu1 %v2726_v11  ;;  %v2715_v16 = vld [vmem:[#allocation5 + $0x24] ss:$8 sps:$4 sm:$0xff]   ;;  %v2717_v17 = vld [vmem:[#allocation5 + $0x20] ss:$8 sps:$4 sm:$0xff]   ;;  %v2718_v20 = vld [vmem:[#allocation5 + $0x14] ss:$8 sps:$4 sm:$0xff]  }
  0x6a   :  { %256 = vmatprep.subr.bf16.mxu0 %v2706_v5  ;;  %503 = vmatprep.subr.bf16.mxu1 %v2727_v12  ;;  %v2733_v19 = vld [vmem:[#allocation8 + $0x44] ss:$8 sps:$4 sm:$0xff]   ;;  %v2735_v22 = vld [vmem:[#allocation8 + $0x40] ss:$8 sps:$4 sm:$0xff]   ;;  %v2736_v23 = vld [vmem:[#allocation8 + $0x34] ss:$8 sps:$4 sm:$0xff]  }
  0x6b   :  { %v2720_v21 = vld [vmem:[#allocation5 + $0x10] ss:$8 sps:$4 sm:$0xff]   ;;  %v2721_v24 = vld [vmem:[#allocation5 + $0x4] ss:$8 sps:$4 sm:$0xff]   ;;  %v2723_v25 = vld [vmem:[#allocation5] ss:$8 sps:$4 sm:$0xff]  }
  0x6c   :  { %v2738_v26 = vld [vmem:[#allocation8 + $0x30] ss:$8 sps:$4 sm:$0xff]   ;;  %v2739_v27 = vld [vmem:[#allocation8 + $0x24] ss:$8 sps:$4 sm:$0xff]   ;;  %v2741_v29 = vld [vmem:[#allocation8 + $0x20] ss:$8 sps:$4 sm:$0xff]  }
  0x6d   :  { %257 = vmatpush1.bf16.msra.mxu0 %v2708_v6  ;;  %504 = vmatpush1.bf16.msra.mxu1 %v2729_v14  ;;  %v143_v28 = vld [vmem:[#allocation2] sm:$0xf]  ;;  %v2745_v32 = vld [vmem:[#allocation8 + $0x4] ss:$8 sps:$4 sm:$0xff]   ;;  %v2747_v33 = vld [vmem:[#allocation8] ss:$8 sps:$4 sm:$0xff]  }
  0x6e   :  { %258 = vmatprep.subr.bf16.mxu0 %v2709_v7  ;;  %505 = vmatprep.subr.bf16.mxu1 %v2730_v15  ;;  %v2742_v30 = vld [vmem:[#allocation8 + $0x14] ss:$8 sps:$4 sm:$0xff]   ;;  %v2744_v31 = vld [vmem:[#allocation8 + $0x10] ss:$8 sps:$4 sm:$0xff]   ;;  %v2751_v36 = vld [vmem:[#allocation8 + $0xe4] ss:$8 sps:$4 sm:$0xff]   ;;  %v162_v15 = vlaneseq }
  0x6f   :  { %v2748_v34 = vld [vmem:[#allocation8 + $0xf4] ss:$8 sps:$4 sm:$0xff]   ;;  %v2750_v35 = vld [vmem:[#allocation8 + $0xf0] ss:$8 sps:$4 sm:$0xff]   ;;  %v2753_v37 = vld [vmem:[#allocation8 + $0xe0] ss:$8 sps:$4 sm:$0xff]  }
  0x70   :  { %v2754_v38 = vld [vmem:[#allocation8 + $0xd4] ss:$8 sps:$4 sm:$0xff]   ;;  %v2756_v39 = vld [vmem:[#allocation8 + $0xd0] ss:$8 sps:$4 sm:$0xff]   ;;  %v2757_v40 = vld [vmem:[#allocation8 + $0xc4] ss:$8 sps:$4 sm:$0xff]  }
  0x71   :  { %259 = vmatpush1.bf16.msra.mxu0 %v2711_v8  ;;  %506 = vmatpush1.bf16.msra.mxu1 %v2732_v18  ;;  %v2759_v41 = vld [vmem:[#allocation8 + $0xc0] ss:$8 sps:$4 sm:$0xff]   ;;  %v2760_v42 = vld [vmem:[#allocation8 + $0xb4] ss:$8 sps:$4 sm:$0xff]   ;;  %v2762_v43 = vld [vmem:[#allocation8 + $0xb0] ss:$8 sps:$4 sm:$0xff]  }
  0x72   :  { %260 = vmatprep.subr.bf16.mxu0 %v2712_v9  ;;  %507 = vmatprep.subr.bf16.mxu1 %v2733_v19  ;;  %v2763_v44 = vld [vmem:[#allocation8 + $0xa4] ss:$8 sps:$4 sm:$0xff]   ;;  %v2765_v45 = vld [vmem:[#allocation8 + $0xa0] ss:$8 sps:$4 sm:$0xff]   ;;  %v2766_v46 = vld [vmem:[#allocation8 + $0x94] ss:$8 sps:$4 sm:$0xff]  }
  0x73   :  { %v2768_v47 = vld [vmem:[#allocation8 + $0x90] ss:$8 sps:$4 sm:$0xff]   ;;  %v2769_v48 = vld [vmem:[#allocation8 + $0x84] ss:$8 sps:$4 sm:$0xff]   ;;  %v2771_v49 = vld [vmem:[#allocation8 + $0x80] ss:$8 sps:$4 sm:$0xff]  }
  0x74   :  { %v2772_v50 = vld [vmem:[#allocation11 + $0xe0] ss:$16 sps:$4 sm:$0xff]   ;;  %v2774_v51 = vld [vmem:[#allocation11 + $0xe4] ss:$16 sps:$4 sm:$0xff]   ;;  %v2777_v52 = vld [vmem:[#allocation11 + $0xec] ss:$16 sps:$4 sm:$0xff]  }
  0x75   :  { %261 = vmatpush1.bf16.msra.mxu0 %v2714_v13  ;;  %508 = vmatpush1.bf16.msra.mxu1 %v2735_v22  ;;  %v2780_v53 = vld [vmem:[#allocation11 + $0xc4] ss:$16 sps:$4 sm:$0xff]   ;;  %v2778_v54 = vld [vmem:[#allocation11 + $0xc0] ss:$16 sps:$4 sm:$0xff]   ;;  %v160_v18 = vld [vmem:[#allocation7] sm:$0x3] }
  0x76   :  { %262 = vmatprep.subr.bf16.mxu0 %v2715_v16  ;;  %509 = vmatprep.subr.bf16.mxu1 %v2736_v23  ;;  %v2786_v55 = vld [vmem:[#allocation11 + $0xa4] ss:$16 sps:$4 sm:$0xff]   ;;  %v2784_v56 = vld [vmem:[#allocation11 + $0xa0] ss:$16 sps:$4 sm:$0xff]   ;;  %v3390_v16 = vshrl.u32 %v162_v15, 7  ;;  %s2354_s20 = sshll.u32 %s3299_s19, 4  ;;  %s2355_s20 = int_to_ptr.vmem [resolvable:$true] %s2354_s20 }
  0x77   :  { %v2792_v57 = vld [vmem:[#allocation11 + $0x84] ss:$16 sps:$4 sm:$0xff]   ;;  %v2790_v58 = vld [vmem:[#allocation11 + $0x80] ss:$16 sps:$4 sm:$0xff]   ;;  %s3252_s21 = scalar_lea.vmem %s2355_s20, 128  ;;  %p3257_p13 = scmp.lt.s32.totalorder %s2355_s20, %s2355_s20 }
  0x78   :  { %v2798_v59 = vld [vmem:[#allocation11 + $0x64] ss:$16 sps:$4 sm:$0xff]   ;;  %v2796_v60 = vld [vmem:[#allocation11 + $0x60] ss:$16 sps:$4 sm:$0xff]   ;;  %v3396_v19 = vsub.s32 1, %v3390_v16  ;;  %p3253_p12 = scmp.ne.s32.totalorder %s2355_s20, %s3252_s21  ;;  %p3258_p0 = scmp.lt.s32.totalorder %s3252_s21, %s3252_s21 }
  0x79   :  { %263 = vmatpush1.bf16.msra.mxu0 %v2717_v17  ;;  %510 = vmatpush1.bf16.msra.mxu1 %v2738_v26  ;;  %v2804_v61 = vld [vmem:[#allocation11 + $0x44] ss:$16 sps:$4 sm:$0xff]   ;;  %v2802_v62 = vld [vmem:[#allocation11 + $0x40] ss:$16 sps:$4 sm:$0xff]   ;;  %v3393_v17 = vsub.s32 0, %v3390_v16 }
  0x7a   :  { %264 = vmatprep.subr.bf16.mxu0 %v2718_v20  ;;  %511 = vmatprep.subr.bf16.mxu1 %v2739_v27  ;;  %v2810_v63 = vld [vmem:[#allocation11 + $0x24] ss:$16 sps:$4 sm:$0xff]   ;;  %v2808_v0 = vld [vmem:[#allocation11 + $0x20] ss:$16 sps:$4 sm:$0xff]   ;;  %p3259_p1 = por %p3258_p0, %p3257_p13 }
  0x7b   :  { %v2816_v1 = vld [vmem:[#allocation11 + $0x4] ss:$16 sps:$4 sm:$0xff]   ;;  %v2814_v2 = vld [vmem:[#allocation11] ss:$16 sps:$4 sm:$0xff]   ;;  %v165_v20 = vrot.slane %v160_v18, %v3393_v17 }
  0x7c   :  { %v2822_v3 = vld [vmem:[#allocation11 + $0x1e4] ss:$16 sps:$4 sm:$0xff]   ;;  %v2820_v4 = vld [vmem:[#allocation11 + $0x1e0] ss:$16 sps:$4 sm:$0xff]   ;;  %p3260_p2 = pnand %p3259_p1, %p3253_p12 }
  0x7d   :  { %265 = vmatpush1.bf16.msra.mxu0 %v2720_v21  ;;  %512 = vmatpush1.bf16.msra.mxu1 %v2741_v29  ;;  %v2828_v5 = vld [vmem:[#allocation11 + $0x1c4] ss:$16 sps:$4 sm:$0xff]   ;;  %v2826_v6 = vld [vmem:[#allocation11 + $0x1c0] ss:$16 sps:$4 sm:$0xff]   ;;  %v169_v21 = vrot.slane %v160_v18, %v3396_v19 }
  0x7e   :  { %266 = vmatprep.subr.bf16.mxu0 %v2721_v24  ;;  %513 = vmatprep.subr.bf16.mxu1 %v2742_v30  ;;  %v2834_v7 = vld [vmem:[#allocation11 + $0x1a4] ss:$16 sps:$4 sm:$0xff]   ;;  %v2832_v8 = vld [vmem:[#allocation11 + $0x1a0] ss:$16 sps:$4 sm:$0xff]  }
  0x7f   :  { %v2840_v9 = vld [vmem:[#allocation11 + $0x184] ss:$16 sps:$4 sm:$0xff]   ;;  %v2838_v10 = vld [vmem:[#allocation11 + $0x180] ss:$16 sps:$4 sm:$0xff]  }
  0x80   :  { %v2846_v11 = vld [vmem:[#allocation11 + $0x164] ss:$16 sps:$4 sm:$0xff]   ;;  %v2844_v12 = vld [vmem:[#allocation11 + $0x160] ss:$16 sps:$4 sm:$0xff]  }
  0x81   :  { %267 = vmatpush1.bf16.msra.mxu0 %v2723_v25  ;;  %514 = vmatpush1.bf16.msra.mxu1 %v2744_v31  ;;  %v2852_v13 = vld [vmem:[#allocation11 + $0x144] ss:$16 sps:$4 sm:$0xff]   ;;  %v2850_v14 = vld [vmem:[#allocation11 + $0x140] ss:$16 sps:$4 sm:$0xff]   ;;  %v2775_v31 = vld [vmem:[#allocation11 + $0xe8] ss:$16 sps:$4 sm:$0xff]  }
  0x82   :  { %515 = vmatprep.subr.bf16.mxu1 %v2745_v32  ;;  %952 = vmatprep.subr.bf16.mxu0 %v2774_v51  ;;  %v2837_v51 = vld [vmem:[#allocation11 + $0x1ac] ss:$16 sps:$4 sm:$0xff]  }
  0x84   :  { %285 = vmatmul.mubr.bf16.vlgmr.msra.gmra.mxu0 %v143_v28 }
  0x85   :  { %516 = vmatpush1.bf16.msra.mxu1 %v2747_v33  ;;  %953 = vmatpush1.bf16.msra.mxu0 %v2772_v50  ;;  %v2783_v33 = vld [vmem:[#allocation11 + $0xcc] ss:$16 sps:$4 sm:$0xff]   ;;  %v2829_v50 = vld [vmem:[#allocation11 + $0x1c8] ss:$16 sps:$4 sm:$0xff]  }
  0x86   :  { %517 = vmatprep.subr.bf16.mxu1 %v2748_v34  ;;  %954 = vmatprep.subr.bf16.mxu0 %v2780_v53  ;;  %v2781_v34 = vld [vmem:[#allocation11 + $0xc8] ss:$16 sps:$4 sm:$0xff]   ;;  %v2843_v53 = vld [vmem:[#allocation11 + $0x18c] ss:$16 sps:$4 sm:$0xff]  }
  0x89   :  { %518 = vmatpush2.bf16.msra.mxu1 %v2750_v35  ;;  %955 = vmatpush1.bf16.msra.mxu0 %v2778_v54  ;;  %v2789_v35 = vld [vmem:[#allocation11 + $0xac] ss:$16 sps:$4 sm:$0xff]   ;;  %v2841_v54 = vld [vmem:[#allocation11 + $0x188] ss:$16 sps:$4 sm:$0xff]  }
  0x8a   :  { %519 = vmatprep.subr.bf16.mxu1 %v2751_v36  ;;  %956 = vmatprep.subr.bf16.mxu0 %v2786_v55  ;;  %v2787_v36 = vld [vmem:[#allocation11 + $0xa8] ss:$16 sps:$4 sm:$0xff]   ;;  %v2849_v55 = vld [vmem:[#allocation11 + $0x16c] ss:$16 sps:$4 sm:$0xff]  }
  0x8d   :  { %520 = vmatpush2.bf16.msra.mxu1 %v2753_v37  ;;  %957 = vmatpush1.bf16.msra.mxu0 %v2784_v56  ;;  %v2795_v37 = vld [vmem:[#allocation11 + $0x8c] ss:$16 sps:$4 sm:$0xff]   ;;  %v2847_v56 = vld [vmem:[#allocation11 + $0x168] ss:$16 sps:$4 sm:$0xff]  }
  0x8e   :  { %521 = vmatprep.subr.bf16.mxu1 %v2754_v38  ;;  %958 = vmatprep.subr.bf16.mxu0 %v2792_v57  ;;  %v2793_v38 = vld [vmem:[#allocation11 + $0x88] ss:$16 sps:$4 sm:$0xff]   ;;  %v2855_v57 = vld [vmem:[#allocation11 + $0x14c] ss:$16 sps:$4 sm:$0xff]  }
  0x91   :  { %522 = vmatpush2.bf16.msra.mxu1 %v2756_v39  ;;  %959 = vmatpush1.bf16.msra.mxu0 %v2790_v58  ;;  %v2801_v39 = vld [vmem:[#allocation11 + $0x6c] ss:$16 sps:$4 sm:$0xff]   ;;  %v2853_v58 = vld [vmem:[#allocation11 + $0x148] ss:$16 sps:$4 sm:$0xff]  }
  0x92   :  { %523 = vmatprep.subr.bf16.mxu1 %v2757_v40  ;;  %960 = vmatprep.subr.bf16.mxu0 %v2798_v59  ;;  %v2799_v40 = vld [vmem:[#allocation11 + $0x68] ss:$16 sps:$4 sm:$0xff]   ;;  %v2858_v59 = vld [vmem:[#allocation11 + $0x124] ss:$16 sps:$4 sm:$0xff]  }
  0x95   :  { %524 = vmatpush2.bf16.msra.mxu1 %v2759_v41  ;;  %961 = vmatpush1.bf16.msra.mxu0 %v2796_v60  ;;  %v2807_v41 = vld [vmem:[#allocation11 + $0x4c] ss:$16 sps:$4 sm:$0xff]  }
  0x96   :  { %525 = vmatprep.subr.bf16.mxu1 %v2760_v42  ;;  %962 = vmatprep.subr.bf16.mxu0 %v2804_v61  ;;  %v2805_v42 = vld [vmem:[#allocation11 + $0x48] ss:$16 sps:$4 sm:$0xff]   ;;  %v2861_v60 = vld [vmem:[#allocation11 + $0x12c] ss:$16 sps:$4 sm:$0xff]   ;;  %v2856_v61 = vld [vmem:[#allocation11 + $0x120] ss:$16 sps:$4 sm:$0xff]  }
  0x99   :  { %526 = vmatpush2.bf16.msra.mxu1 %v2762_v43  ;;  %963 = vmatpush1.bf16.msra.mxu0 %v2802_v62  ;;  %v2813_v43 = vld [vmem:[#allocation11 + $0x2c] ss:$16 sps:$4 sm:$0xff]   ;;  %v2859_v62 = vld [vmem:[#allocation11 + $0x128] ss:$16 sps:$4 sm:$0xff]  }
  0x9a   :  { %527 = vmatprep.subr.bf16.mxu1 %v2763_v44  ;;  %964 = vmatprep.subr.bf16.mxu0 %v2810_v63  ;;  %v2811_v44 = vld [vmem:[#allocation11 + $0x28] ss:$16 sps:$4 sm:$0xff]   ;;  %v2864_v63 = vld [vmem:[#allocation11 + $0x104] ss:$16 sps:$4 sm:$0xff]  }
  0x9d   :  { %528 = vmatpush2.bf16.msra.mxu1 %v2765_v45  ;;  %965 = vmatpush1.bf16.msra.mxu0 %v2808_v0  ;;  %v2819_v45 = vld [vmem:[#allocation11 + $0xc] ss:$16 sps:$4 sm:$0xff]  }
  0x9e   :  { %529 = vmatprep.subr.bf16.mxu1 %v2766_v46  ;;  %966 = vmatprep.subr.bf16.mxu0 %v2816_v1  ;;  %v2817_v46 = vld [vmem:[#allocation11 + $0x8] ss:$16 sps:$4 sm:$0xff]   ;;  %v2867_v0 = vld [vmem:[#allocation11 + $0x10c] ss:$16 sps:$4 sm:$0xff]   ;;  %v2862_v1 = vld [vmem:[#allocation11 + $0x100] ss:$16 sps:$4 sm:$0xff]  }
  0xa1   :  { %530 = vmatpush2.bf16.msra.mxu1 %v2768_v47  ;;  %967 = vmatpush1.bf16.msra.mxu0 %v2814_v2  ;;  %v2825_v47 = vld [vmem:[#allocation11 + $0x1ec] ss:$16 sps:$4 sm:$0xff]   ;;  %v2865_v2 = vld [vmem:[#allocation11 + $0x108] ss:$16 sps:$4 sm:$0xff]  }
  0xa2   :  { %531 = vmatprep.subr.bf16.mxu1 %v2769_v48  ;;  %968 = vmatprep.subr.bf16.mxu0 %v2822_v3  ;;  %v2823_v48 = vld [vmem:[#allocation11 + $0x1e8] ss:$16 sps:$4 sm:$0xff]   ;;  %v2870_v3 = vld [vmem:[#allocation13 + $0xe4] ss:$16 sps:$4 sm:$0xff]  }
  0xa5   :  { %532 = vmatpush2.bf16.msra.mxu1 %v2771_v49  ;;  %969 = vmatpush2.bf16.msra.mxu0 %v2820_v4  ;;  %v2831_v49 = vld [vmem:[#allocation11 + $0x1cc] ss:$16 sps:$4 sm:$0xff]   ;;  %v2873_v4 = vld [vmem:[#allocation13 + $0x2e4] ss:$16 sps:$4 sm:$0xff]  }
  0xa6   :  { %993 = vmatprep.subr.bf16.mxu1 %v2777_v52  ;;  %970 = vmatprep.subr.bf16.mxu0 %v2828_v5  ;;  %v2835_v52 = vld [vmem:[#allocation11 + $0x1a8] ss:$16 sps:$4 sm:$0xff]   ;;  %v329_v5 = vld [vmem:[#allocation10] sm:$0x3] }
  0xa9   :  { %971 = vmatpush2.bf16.msra.mxu0 %v2826_v6  ;;  %v334_v6 = vrot.slane %v329_v5, %v3393_v17 }
  0xaa   :  { %972 = vmatprep.subr.bf16.mxu0 %v2834_v7  ;;  %v338_v7 = vrot.slane %v329_v5, %v3396_v19  ;;  %v2940_v5 = vld [vmem:[#allocation13 + $0x160] ss:$16 sps:$4 sm:$0xff]  }
  0xad   :  { %973 = vmatpush2.bf16.msra.mxu0 %v2832_v8 }
  0xae   :  { %974 = vmatprep.subr.bf16.mxu0 %v2840_v9 }
  0xb1   :  { %975 = vmatpush2.bf16.msra.mxu0 %v2838_v10 }
  0xb2   :  { %976 = vmatprep.subr.bf16.mxu0 %v2846_v11 }
  0xb5   :  { %977 = vmatpush2.bf16.msra.mxu0 %v2844_v12 }
  0xb6   :  { %978 = vmatprep.subr.bf16.mxu0 %v2852_v13 }
  0xb9   :  { %979 = vmatpush2.bf16.msra.mxu0 %v2850_v14 }
  0xba   :  { %980 = vmatprep.subr.bf16.mxu0 %v2858_v59  ;;  %v2930_v59 = vld [vmem:[#allocation13 + $0x1a4] ss:$16 sps:$4 sm:$0xff]  }
  0xbd   :  { %981 = vmatpush2.bf16.msra.mxu0 %v2856_v61  ;;  %v2928_v61 = vld [vmem:[#allocation13 + $0x1a0] ss:$16 sps:$4 sm:$0xff]  }
  0xbe   :  { %982 = vmatprep.subr.bf16.mxu0 %v2864_v63  ;;  %v2936_v63 = vld [vmem:[#allocation13 + $0x184] ss:$16 sps:$4 sm:$0xff]  }
  0xc1   :  { %983 = vmatpush2.bf16.msra.mxu0 %v2862_v1  ;;  %v2934_v1 = vld [vmem:[#allocation13 + $0x180] ss:$16 sps:$4 sm:$0xff]  }
  0xc2   :  { %1832 = vmatprep.subr.bf16.mxu0 %v2870_v3  ;;  %v2942_v3 = vld [vmem:[#allocation13 + $0x164] ss:$16 sps:$4 sm:$0xff]  }
 0x144   :  { %v286_v22 = vpop.f32.mrf.mxu0 }
 0x145   :  { %v287_v23 = vadd.f32 %v286_v22, %v165_v20  ;;  %v2868_v20 = vld [vmem:[#allocation13 + $0xe0] ss:$16 sps:$4 sm:$0xff]  }
 0x146   :  { %v288_v24 = vpop.f32.mrf.mxu0 }
 0x147   :  { %v289_v25 = vadd.f32 %v288_v24, %v169_v21  ;;  %v293_v26 = vmax.f32 %v287_v23, 0.0  ;;  %v2871_v21 = vld [vmem:[#allocation13 + $0x2e0] ss:$16 sps:$4 sm:$0xff]   ;;  %v2876_v23 = vld [vmem:[#allocation13 + $0xc4] ss:$16 sps:$4 sm:$0xff]  }
 0x148   :  { %v290_v27 = vpop.f32.mrf.mxu0  ;;  %v2879_v24 = vld [vmem:[#allocation13 + $0x2c4] ss:$16 sps:$4 sm:$0xff]  }
 0x149   :  { %v294_v28 = vmax.f32 %v289_v25, 0.0  ;;  %v295_v32 = vpack.c.bf16 %v293_v26, %v293_v26  ;;  %v2874_v25 = vld [vmem:[#allocation13 + $0xc0] ss:$16 sps:$4 sm:$0xff]   ;;  %v2882_v27 = vld [vmem:[#allocation13 + $0xa4] ss:$16 sps:$4 sm:$0xff]  }
 0x14a   :  { %v291_v29 = vpop.f32.mrf.mxu0  ;;  %v2877_v26 = vld [vmem:[#allocation13 + $0x2c0] ss:$16 sps:$4 sm:$0xff]  }
 0x14b   :  { %v296_v30 = vpack.c.bf16 %v294_v28, %v294_v28  ;;  %v2885_v28 = vld [vmem:[#allocation13 + $0x2a4] ss:$16 sps:$4 sm:$0xff]   ;;  %v2880_v29 = vld [vmem:[#allocation13 + $0xa0] ss:$16 sps:$4 sm:$0xff]  }
 0x14d   :  { %533 = vmatprep.mubr.bf16.mxu1 %v296_v30  ;;  %v2883_v30 = vld [vmem:[#allocation13 + $0x2a0] ss:$16 sps:$4 sm:$0xff]  }
 0x14e   :  { %534 = vmatmul.mubr.bf16.vlgmr.msra.gmra.mxu1 %v295_v32  ;;  %v2891_v32 = vld [vmem:[#allocation13 + $0x284] ss:$16 sps:$4 sm:$0xff]  }
 0x14f   :  { %994 = vmatpush1.bf16.msra.mxu1 %v2775_v31  ;;  %v2888_v31 = vld [vmem:[#allocation13 + $0x84] ss:$16 sps:$4 sm:$0xff]  }
 0x150   :  { %995 = vmatprep.subr.bf16.mxu1 %v2783_v33  ;;  %v2886_v33 = vld [vmem:[#allocation13 + $0x80] ss:$16 sps:$4 sm:$0xff]  }
 0x153   :  { %996 = vmatpush1.bf16.msra.mxu1 %v2781_v34  ;;  %v2889_v34 = vld [vmem:[#allocation13 + $0x280] ss:$16 sps:$4 sm:$0xff]  }
 0x154   :  { %997 = vmatprep.subr.bf16.mxu1 %v2789_v35  ;;  %v2894_v35 = vld [vmem:[#allocation13 + $0x64] ss:$16 sps:$4 sm:$0xff]  }
 0x157   :  { %998 = vmatpush1.bf16.msra.mxu1 %v2787_v36  ;;  %v2897_v36 = vld [vmem:[#allocation13 + $0x264] ss:$16 sps:$4 sm:$0xff]  }
 0x158   :  { %999 = vmatprep.subr.bf16.mxu1 %v2795_v37  ;;  %v2892_v37 = vld [vmem:[#allocation13 + $0x60] ss:$16 sps:$4 sm:$0xff]  }
 0x15b   :  { %1000 = vmatpush1.bf16.msra.mxu1 %v2793_v38  ;;  %v2895_v38 = vld [vmem:[#allocation13 + $0x260] ss:$16 sps:$4 sm:$0xff]  }
 0x15c   :  { %1001 = vmatprep.subr.bf16.mxu1 %v2801_v39  ;;  %v2900_v39 = vld [vmem:[#allocation13 + $0x44] ss:$16 sps:$4 sm:$0xff]  }
 0x15f   :  { %1002 = vmatpush1.bf16.msra.mxu1 %v2799_v40  ;;  %v2903_v40 = vld [vmem:[#allocation13 + $0x244] ss:$16 sps:$4 sm:$0xff]  }
 0x160   :  { %1003 = vmatprep.subr.bf16.mxu1 %v2807_v41  ;;  %v2898_v41 = vld [vmem:[#allocation13 + $0x40] ss:$16 sps:$4 sm:$0xff]  }
 0x163   :  { %1004 = vmatpush1.bf16.msra.mxu1 %v2805_v42  ;;  %v2901_v42 = vld [vmem:[#allocation13 + $0x240] ss:$16 sps:$4 sm:$0xff]  }
 0x164   :  { %1005 = vmatprep.subr.bf16.mxu1 %v2813_v43  ;;  %v2906_v43 = vld [vmem:[#allocation13 + $0x24] ss:$16 sps:$4 sm:$0xff]  }
 0x167   :  { %1006 = vmatpush1.bf16.msra.mxu1 %v2811_v44  ;;  %v2909_v44 = vld [vmem:[#allocation13 + $0x224] ss:$16 sps:$4 sm:$0xff]  }
 0x168   :  { %1007 = vmatprep.subr.bf16.mxu1 %v2819_v45  ;;  %v2904_v45 = vld [vmem:[#allocation13 + $0x20] ss:$16 sps:$4 sm:$0xff]  }
 0x16b   :  { %1008 = vmatpush1.bf16.msra.mxu1 %v2817_v46  ;;  %v2907_v46 = vld [vmem:[#allocation13 + $0x220] ss:$16 sps:$4 sm:$0xff]  }
 0x16c   :  { %1009 = vmatprep.subr.bf16.mxu1 %v2825_v47  ;;  %v2912_v47 = vld [vmem:[#allocation13 + $0x4] ss:$16 sps:$4 sm:$0xff]  }
 0x16f   :  { %1010 = vmatpush2.bf16.msra.mxu1 %v2823_v48  ;;  %v2915_v48 = vld [vmem:[#allocation13 + $0x204] ss:$16 sps:$4 sm:$0xff]  }
 0x170   :  { %1011 = vmatprep.subr.bf16.mxu1 %v2831_v49  ;;  %v2910_v49 = vld [vmem:[#allocation13] ss:$16 sps:$4 sm:$0xff]  }
 0x173   :  { %1012 = vmatpush2.bf16.msra.mxu1 %v2829_v50  ;;  %v2913_v50 = vld [vmem:[#allocation13 + $0x200] ss:$16 sps:$4 sm:$0xff]  }
 0x174   :  { %1013 = vmatprep.subr.bf16.mxu1 %v2837_v51  ;;  %v2918_v51 = vld [vmem:[#allocation13 + $0x1e4] ss:$16 sps:$4 sm:$0xff]  }
 0x177   :  { %1014 = vmatpush2.bf16.msra.mxu1 %v2835_v52  ;;  %v2921_v52 = vld [vmem:[#allocation13 + $0x3e4] ss:$16 sps:$4 sm:$0xff]  }
 0x178   :  { %1015 = vmatprep.subr.bf16.mxu1 %v2843_v53  ;;  %v2916_v53 = vld [vmem:[#allocation13 + $0x1e0] ss:$16 sps:$4 sm:$0xff]  }
 0x17b   :  { %1016 = vmatpush2.bf16.msra.mxu1 %v2841_v54  ;;  %v2919_v54 = vld [vmem:[#allocation13 + $0x3e0] ss:$16 sps:$4 sm:$0xff]  }
 0x17c   :  { %1017 = vmatprep.subr.bf16.mxu1 %v2849_v55  ;;  %v2924_v55 = vld [vmem:[#allocation13 + $0x1c4] ss:$16 sps:$4 sm:$0xff]  }
 0x17f   :  { %1018 = vmatpush2.bf16.msra.mxu1 %v2847_v56  ;;  %v2927_v56 = vld [vmem:[#allocation13 + $0x3c4] ss:$16 sps:$4 sm:$0xff]  }
 0x180   :  { %1019 = vmatprep.subr.bf16.mxu1 %v2855_v57  ;;  %v2922_v57 = vld [vmem:[#allocation13 + $0x1c0] ss:$16 sps:$4 sm:$0xff]  }
 0x183   :  { %1020 = vmatpush2.bf16.msra.mxu1 %v2853_v58  ;;  %v2925_v58 = vld [vmem:[#allocation13 + $0x3c0] ss:$16 sps:$4 sm:$0xff]  }
 0x184   :  { %1021 = vmatprep.subr.bf16.mxu1 %v2861_v60  ;;  %v2933_v60 = vld [vmem:[#allocation13 + $0x3a4] ss:$16 sps:$4 sm:$0xff]  }
 0x187   :  { %1022 = vmatpush2.bf16.msra.mxu1 %v2859_v62  ;;  %v2931_v62 = vld [vmem:[#allocation13 + $0x3a0] ss:$16 sps:$4 sm:$0xff]  }
 0x188   :  { %1023 = vmatprep.subr.bf16.mxu1 %v2867_v0  ;;  %v2939_v0 = vld [vmem:[#allocation13 + $0x384] ss:$16 sps:$4 sm:$0xff]  }
 0x18b   :  { %1024 = vmatpush2.bf16.msra.mxu1 %v2865_v2  ;;  %v2937_v2 = vld [vmem:[#allocation13 + $0x380] ss:$16 sps:$4 sm:$0xff]  }
 0x18c   :  { %1873 = vmatprep.subr.bf16.mxu1 %v2873_v4  ;;  %v2945_v4 = vld [vmem:[#allocation13 + $0x364] ss:$16 sps:$4 sm:$0xff]  }
 0x20e   :  { %v535_v8 = vpop.f32.mrf.mxu1 }
 0x20f   :  { %v536_v9 = vadd.f32 %v535_v8, %v334_v6  ;;  %v2943_v6 = vld [vmem:[#allocation13 + $0x360] ss:$16 sps:$4 sm:$0xff]   ;;  %v2951_v8 = vld [vmem:[#allocation13 + $0x344] ss:$16 sps:$4 sm:$0xff]  }
 0x210   :  { %v537_v10 = vpop.f32.mrf.mxu1 }
 0x211   :  { %v538_v11 = vadd.f32 %v537_v10, %v338_v7  ;;  %v542_v12 = vmax.f32 %v536_v9, 0.0  ;;  %v2948_v7 = vld [vmem:[#allocation13 + $0x144] ss:$16 sps:$4 sm:$0xff]   ;;  %v2946_v9 = vld [vmem:[#allocation13 + $0x140] ss:$16 sps:$4 sm:$0xff]  }
 0x212   :  { %v539_v13 = vpop.f32.mrf.mxu1  ;;  %v2949_v10 = vld [vmem:[#allocation13 + $0x340] ss:$16 sps:$4 sm:$0xff]  }
 0x213   :  { %v543_v14 = vmax.f32 %v538_v11, 0.0  ;;  %v544_v22 = vpack.c.bf16 %v542_v12, %v542_v12  ;;  %v2954_v11 = vld [vmem:[#allocation13 + $0x124] ss:$16 sps:$4 sm:$0xff]   ;;  %v2952_v13 = vld [vmem:[#allocation13 + $0x120] ss:$16 sps:$4 sm:$0xff]  }
 0x214   :  { %v540_v15 = vpop.f32.mrf.mxu1  ;;  %v2957_v12 = vld [vmem:[#allocation13 + $0x324] ss:$16 sps:$4 sm:$0xff]  }
 0x215   :  { %v545_v18 = vpack.c.bf16 %v543_v14, %v543_v14  ;;  %v2955_v14 = vld [vmem:[#allocation13 + $0x320] ss:$16 sps:$4 sm:$0xff]   ;;  %v2960_v15 = vld [vmem:[#allocation13 + $0x104] ss:$16 sps:$4 sm:$0xff]  }
 0x217   :  { %984 = vmatprep.mubr.bf16.mxu0 %v545_v18  ;;  %1025 = vmatprep.mubr.bf16.mxu1 %v545_v18  ;;  %v2963_v18 = vld [vmem:[#allocation13 + $0x304] ss:$16 sps:$4 sm:$0xff]  }
 0x218   :  { %985 = vmatmul.mubr.bf16.vlgmr.msra.gmra.mxu0 %v544_v22  ;;  %1026 = vmatmul.mubr.bf16.vlgmr.msra.gmra.mxu1 %v544_v22  ;;  %v2966_v22 = vld [vmem:[#allocation13 + $0xec] ss:$16 sps:$4 sm:$0xff]  }
 0x219   :  { %1833 = vmatpush1.bf16.msra.mxu0 %v2868_v20  ;;  %1874 = vmatpush1.bf16.msra.mxu1 %v2871_v21  ;;  %v2958_v20 = vld [vmem:[#allocation13 + $0x100] ss:$16 sps:$4 sm:$0xff]  }
 0x21a   :  { %1834 = vmatprep.subr.bf16.mxu0 %v2876_v23  ;;  %1875 = vmatprep.subr.bf16.mxu1 %v2879_v24  ;;  %v2961_v21 = vld [vmem:[#allocation13 + $0x300] ss:$16 sps:$4 sm:$0xff]   ;;  %v2969_v23 = vld [vmem:[#allocation13 + $0x2ec] ss:$16 sps:$4 sm:$0xff]   ;;  %v622_v24 = vsub.s32 2, %v3390_v16 }
 0x21d   :  { %1835 = vmatpush1.bf16.msra.mxu0 %v2874_v25  ;;  %1876 = vmatpush1.bf16.msra.mxu1 %v2877_v26  ;;  %v610_v25 = vld [vmem:[%s3442_s6] sm:$0xf]  ;;  %v626_v26 = vsub.s32 3, %v3390_v16 }
 0x21e   :  { %1836 = vmatprep.subr.bf16.mxu0 %v2882_v27  ;;  %1877 = vmatprep.subr.bf16.mxu1 %v2885_v28  ;;  %v615_v27 = vrot.slane %v610_v25, %v3393_v17  ;;  %v623_v28 = vrot.slane %v610_v25, %v622_v24 }
 0x221   :  { %1837 = vmatpush1.bf16.msra.mxu0 %v2880_v29  ;;  %1878 = vmatpush1.bf16.msra.mxu1 %v2883_v30  ;;  %v619_v29 = vrot.slane %v610_v25, %v3396_v19  ;;  %v627_v30 = vrot.slane %v610_v25, %v626_v26  ;;  %v3020_v25 = vld [vmem:[#allocation13 + $0x1cc] ss:$16 sps:$4 sm:$0xff]  }
 0x222   :  { %1838 = vmatprep.subr.bf16.mxu0 %v2888_v31  ;;  %1879 = vmatprep.subr.bf16.mxu1 %v2891_v32 }
 0x225   :  { %1839 = vmatpush1.bf16.msra.mxu0 %v2886_v33  ;;  %1880 = vmatpush1.bf16.msra.mxu1 %v2889_v34 }
 0x226   :  { %1840 = vmatprep.subr.bf16.mxu0 %v2894_v35  ;;  %1881 = vmatprep.subr.bf16.mxu1 %v2897_v36 }
 0x229   :  { %1841 = vmatpush1.bf16.msra.mxu0 %v2892_v37  ;;  %1882 = vmatpush1.bf16.msra.mxu1 %v2895_v38 }
 0x22a   :  { %1842 = vmatprep.subr.bf16.mxu0 %v2900_v39  ;;  %1883 = vmatprep.subr.bf16.mxu1 %v2903_v40 }
 0x22d   :  { %1843 = vmatpush1.bf16.msra.mxu0 %v2898_v41  ;;  %1884 = vmatpush1.bf16.msra.mxu1 %v2901_v42 }
 0x22e   :  { %1844 = vmatprep.subr.bf16.mxu0 %v2906_v43  ;;  %1885 = vmatprep.subr.bf16.mxu1 %v2909_v44 }
 0x231   :  { %1845 = vmatpush1.bf16.msra.mxu0 %v2904_v45  ;;  %1886 = vmatpush1.bf16.msra.mxu1 %v2907_v46 }
 0x232   :  { %1846 = vmatprep.subr.bf16.mxu0 %v2912_v47  ;;  %1887 = vmatprep.subr.bf16.mxu1 %v2915_v48 }
 0x235   :  { %1847 = vmatpush1.bf16.msra.mxu0 %v2910_v49  ;;  %1888 = vmatpush1.bf16.msra.mxu1 %v2913_v50  ;;  %v2964_v49 = vld [vmem:[#allocation13 + $0xe8] ss:$16 sps:$4 sm:$0xff]  }
 0x236   :  { %1848 = vmatprep.subr.bf16.mxu0 %v2918_v51  ;;  %1889 = vmatprep.subr.bf16.mxu1 %v2921_v52  ;;  %v2967_v50 = vld [vmem:[#allocation13 + $0x2e8] ss:$16 sps:$4 sm:$0xff]  }
 0x239   :  { %1849 = vmatpush2.bf16.msra.mxu0 %v2916_v53  ;;  %1890 = vmatpush2.bf16.msra.mxu1 %v2919_v54  ;;  %v2972_v53 = vld [vmem:[#allocation13 + $0xcc] ss:$16 sps:$4 sm:$0xff]  }
 0x23a   :  { %1850 = vmatprep.subr.bf16.mxu0 %v2924_v55  ;;  %1891 = vmatprep.subr.bf16.mxu1 %v2927_v56  ;;  %v2975_v54 = vld [vmem:[#allocation13 + $0x2cc] ss:$16 sps:$4 sm:$0xff]   ;;  %v2970_v55 = vld [vmem:[#allocation13 + $0xc8] ss:$16 sps:$4 sm:$0xff]  }
 0x23b   :  { %v2973_v56 = vld [vmem:[#allocation13 + $0x2c8] ss:$16 sps:$4 sm:$0xff]  }
 0x23d   :  { %1851 = vmatpush2.bf16.msra.mxu0 %v2922_v57  ;;  %1892 = vmatpush2.bf16.msra.mxu1 %v2925_v58  ;;  %v2978_v57 = vld [vmem:[#allocation13 + $0xac] ss:$16 sps:$4 sm:$0xff]  }
 0x23e   :  { %1852 = vmatprep.subr.bf16.mxu0 %v2930_v59  ;;  %1893 = vmatprep.subr.bf16.mxu1 %v2933_v60  ;;  %v2981_v58 = vld [vmem:[#allocation13 + $0x2ac] ss:$16 sps:$4 sm:$0xff]   ;;  %v2976_v59 = vld [vmem:[#allocation13 + $0xa8] ss:$16 sps:$4 sm:$0xff]  }
 0x23f   :  { %v2979_v60 = vld [vmem:[#allocation13 + $0x2a8] ss:$16 sps:$4 sm:$0xff]  }
 0x241   :  { %1853 = vmatpush2.bf16.msra.mxu0 %v2928_v61  ;;  %1894 = vmatpush2.bf16.msra.mxu1 %v2931_v62  ;;  %v2984_v61 = vld [vmem:[#allocation13 + $0x8c] ss:$16 sps:$4 sm:$0xff]  }
 0x242   :  { %1854 = vmatprep.subr.bf16.mxu0 %v2936_v63  ;;  %1895 = vmatprep.subr.bf16.mxu1 %v2939_v0  ;;  %v2987_v62 = vld [vmem:[#allocation13 + $0x28c] ss:$16 sps:$4 sm:$0xff]   ;;  %v2982_v63 = vld [vmem:[#allocation13 + $0x88] ss:$16 sps:$4 sm:$0xff]  }
 0x243   :  { %v2985_v0 = vld [vmem:[#allocation13 + $0x288] ss:$16 sps:$4 sm:$0xff]  }
 0x245   :  { %1855 = vmatpush2.bf16.msra.mxu0 %v2934_v1  ;;  %1896 = vmatpush2.bf16.msra.mxu1 %v2937_v2  ;;  %v2990_v1 = vld [vmem:[#allocation13 + $0x6c] ss:$16 sps:$4 sm:$0xff]  }
 0x246   :  { %1856 = vmatprep.subr.bf16.mxu0 %v2942_v3  ;;  %1897 = vmatprep.subr.bf16.mxu1 %v2945_v4  ;;  %v2993_v2 = vld [vmem:[#allocation13 + $0x26c] ss:$16 sps:$4 sm:$0xff]   ;;  %v2988_v3 = vld [vmem:[#allocation13 + $0x68] ss:$16 sps:$4 sm:$0xff]  }
 0x247   :  { %v2991_v4 = vld [vmem:[#allocation13 + $0x268] ss:$16 sps:$4 sm:$0xff]  }
 0x249   :  { %1857 = vmatpush2.bf16.msra.mxu0 %v2940_v5  ;;  %1898 = vmatpush2.bf16.msra.mxu1 %v2943_v6  ;;  %v2996_v5 = vld [vmem:[#allocation13 + $0x4c] ss:$16 sps:$4 sm:$0xff]  }
 0x24a   :  { %1858 = vmatprep.subr.bf16.mxu0 %v2948_v7  ;;  %1899 = vmatprep.subr.bf16.mxu1 %v2951_v8  ;;  %v2999_v6 = vld [vmem:[#allocation13 + $0x24c] ss:$16 sps:$4 sm:$0xff]   ;;  %v2994_v7 = vld [vmem:[#allocation13 + $0x48] ss:$16 sps:$4 sm:$0xff]  }
 0x24b   :  { %v2997_v8 = vld [vmem:[#allocation13 + $0x248] ss:$16 sps:$4 sm:$0xff]  }
 0x24d   :  { %1859 = vmatpush2.bf16.msra.mxu0 %v2946_v9  ;;  %1900 = vmatpush2.bf16.msra.mxu1 %v2949_v10  ;;  %v3002_v9 = vld [vmem:[#allocation13 + $0x2c] ss:$16 sps:$4 sm:$0xff]  }
 0x24e   :  { %1860 = vmatprep.subr.bf16.mxu0 %v2954_v11  ;;  %1901 = vmatprep.subr.bf16.mxu1 %v2957_v12  ;;  %v3005_v10 = vld [vmem:[#allocation13 + $0x22c] ss:$16 sps:$4 sm:$0xff]   ;;  %v3000_v11 = vld [vmem:[#allocation13 + $0x28] ss:$16 sps:$4 sm:$0xff]  }
 0x24f   :  { %v3003_v12 = vld [vmem:[#allocation13 + $0x228] ss:$16 sps:$4 sm:$0xff]  }
 0x251   :  { %1861 = vmatpush2.bf16.msra.mxu0 %v2952_v13  ;;  %1902 = vmatpush2.bf16.msra.mxu1 %v2955_v14  ;;  %v3008_v13 = vld [vmem:[#allocation13 + $0xc] ss:$16 sps:$4 sm:$0xff]  }
 0x252   :  { %1862 = vmatprep.subr.bf16.mxu0 %v2960_v15  ;;  %1903 = vmatprep.subr.bf16.mxu1 %v2963_v18  ;;  %v3011_v14 = vld [vmem:[#allocation13 + $0x20c] ss:$16 sps:$4 sm:$0xff]   ;;  %v3006_v15 = vld [vmem:[#allocation13 + $0x8] ss:$16 sps:$4 sm:$0xff]  }
 0x253   :  { %v3009_v18 = vld [vmem:[#allocation13 + $0x208] ss:$16 sps:$4 sm:$0xff]  }
 0x255   :  { %1863 = vmatpush2.bf16.msra.mxu0 %v2958_v20  ;;  %1904 = vmatpush2.bf16.msra.mxu1 %v2961_v21  ;;  %v3014_v20 = vld [vmem:[#allocation13 + $0x1ec] ss:$16 sps:$4 sm:$0xff]  }
 0x256   :  { %1914 = vmatprep.subr.bf16.mxu0 %v2966_v22  ;;  %1955 = vmatprep.subr.bf16.mxu1 %v2969_v23  ;;  %v3017_v21 = vld [vmem:[#allocation13 + $0x3ec] ss:$16 sps:$4 sm:$0xff]   ;;  %v3012_v22 = vld [vmem:[#allocation13 + $0x1e8] ss:$16 sps:$4 sm:$0xff]  }
 0x257   :  { %v3015_v23 = vld [vmem:[#allocation13 + $0x3e8] ss:$16 sps:$4 sm:$0xff]  }
 0x2d8   :  { %v986_v31 = vpop.f32.mrf.mxu0  ;;  %v1027_v32 = vpop.f32.mrf.mxu1 }
 0x2d9   :  { %v987_v33 = vadd.f32 %v986_v31, %v615_v27  ;;  %v1028_v34 = vadd.f32 %v1027_v32, %v623_v28  ;;  %v3023_v27 = vld [vmem:[#allocation13 + $0x3cc] ss:$16 sps:$4 sm:$0xff]   ;;  %v3018_v28 = vld [vmem:[#allocation13 + $0x1c8] ss:$16 sps:$4 sm:$0xff]  }
 0x2da   :  { %v988_v35 = vpop.f32.mrf.mxu0  ;;  %v1029_v36 = vpop.f32.mrf.mxu1  ;;  %v3029_v31 = vld [vmem:[#allocation13 + $0x3ac] ss:$16 sps:$4 sm:$0xff]   ;;  %v3024_v32 = vld [vmem:[#allocation13 + $0x1a8] ss:$16 sps:$4 sm:$0xff]  }
 0x2db   :  { %v989_v37 = vadd.f32 %v988_v35, %v619_v29  ;;  %v1030_v38 = vadd.f32 %v1029_v36, %v627_v30  ;;  %v1034_v39 = vmax.f32 %v987_v33, 0.0  ;;  %v1036_v40 = vmax.f32 %v1028_v34, 0.0  ;;  %v3021_v29 = vld [vmem:[#allocation13 + $0x3c8] ss:$16 sps:$4 sm:$0xff]   ;;  %v3026_v30 = vld [vmem:[#allocation13 + $0x1ac] ss:$16 sps:$4 sm:$0xff]  }
 0x2dc   :  { %v990_v41 = vpop.f32.mrf.mxu0  ;;  %v1031_v42 = vpop.f32.mrf.mxu1  ;;  %v3027_v33 = vld [vmem:[#allocation13 + $0x3a8] ss:$16 sps:$4 sm:$0xff]   ;;  %v3032_v34 = vld [vmem:[#allocation13 + $0x18c] ss:$16 sps:$4 sm:$0xff]  }
 0x2dd   :  { %v1035_v43 = vmax.f32 %v989_v37, 0.0  ;;  %v1037_v44 = vmax.f32 %v1030_v38, 0.0  ;;  %v3413_v51 = vpack.c.bf16 %v1034_v39, %v1034_v39  ;;  %v3415_v52 = vpack.c.bf16 %v1036_v40, %v1036_v40  ;;  %v3035_v35 = vld [vmem:[#allocation13 + $0x38c] ss:$16 sps:$4 sm:$0xff]   ;;  %v3030_v36 = vld [vmem:[#allocation13 + $0x188] ss:$16 sps:$4 sm:$0xff]  }
 0x2de   :  { %v991_v45 = vpop.f32.mrf.mxu0  ;;  %v1032_v46 = vpop.f32.mrf.mxu1  ;;  %v3033_v37 = vld [vmem:[#allocation13 + $0x388] ss:$16 sps:$4 sm:$0xff]   ;;  %v3038_v38 = vld [vmem:[#allocation13 + $0x16c] ss:$16 sps:$4 sm:$0xff]  }
 0x2df   :  { %v1039_v47 = vpack.c.bf16 %v1035_v43, %v1035_v43  ;;  %v1041_v48 = vpack.c.bf16 %v1037_v44, %v1037_v44  ;;  %v3041_v39 = vld [vmem:[#allocation13 + $0x36c] ss:$16 sps:$4 sm:$0xff]   ;;  %v3036_v40 = vld [vmem:[#allocation13 + $0x168] ss:$16 sps:$4 sm:$0xff]  }
 0x2e0   :  { %v3039_v41 = vld [vmem:[#allocation13 + $0x368] ss:$16 sps:$4 sm:$0xff]   ;;  %v3044_v42 = vld [vmem:[#allocation13 + $0x14c] ss:$16 sps:$4 sm:$0xff]  }
 0x2e1   :  { %1864 = vmatprep.mubr.bf16.mxu0 %v1039_v47  ;;  %1905 = vmatprep.mubr.bf16.mxu1 %v1041_v48  ;;  %v3047_v43 = vld [vmem:[#allocation13 + $0x34c] ss:$16 sps:$4 sm:$0xff]   ;;  %v3042_v44 = vld [vmem:[#allocation13 + $0x148] ss:$16 sps:$4 sm:$0xff]  }
 0x2e2   :  { %1865 = vmatmul.mubr.bf16.vlgmr.msra.gmra.mxu0 %v3413_v51  ;;  %1906 = vmatmul.mubr.bf16.vlgmr.msra.gmra.mxu1 %v3415_v52  ;;  %v3045_v45 = vld [vmem:[#allocation13 + $0x348] ss:$16 sps:$4 sm:$0xff]   ;;  %v3050_v46 = vld [vmem:[#allocation13 + $0x12c] ss:$16 sps:$4 sm:$0xff]  }
 0x2e3   :  { %1915 = vmatpush1.bf16.msra.mxu0 %v2964_v49  ;;  %1956 = vmatpush1.bf16.msra.mxu1 %v2967_v50  ;;  %v3051_v49 = vld [vmem:[#allocation13 + $0x328] ss:$16 sps:$4 sm:$0xff]   ;;  %v3056_v50 = vld [vmem:[#allocation13 + $0x10c] ss:$16 sps:$4 sm:$0xff]  }
 0x2e4   :  { %1946 = vmatprep.mubr.bf16.mxu0 %v1039_v47  ;;  %1987 = vmatprep.mubr.bf16.mxu1 %v1041_v48  ;;  %v3053_v47 = vld [vmem:[#allocation13 + $0x32c] ss:$16 sps:$4 sm:$0xff]   ;;  %v3048_v48 = vld [vmem:[#allocation13 + $0x128] ss:$16 sps:$4 sm:$0xff]  }
 0x2e5   :  { %1916 = vmatprep.subr.bf16.mxu0 %v2972_v53  ;;  %1957 = vmatprep.subr.bf16.mxu1 %v2975_v54  ;;  %v3059_v53 = vld [vmem:[#allocation13 + $0x30c] ss:$16 sps:$4 sm:$0xff]   ;;  %v3054_v54 = vld [vmem:[#allocation13 + $0x108] ss:$16 sps:$4 sm:$0xff]  }
 0x2e7   :  { %1917 = vmatpush1.bf16.msra.mxu0 %v2970_v55  ;;  %1958 = vmatpush1.bf16.msra.mxu1 %v2973_v56  ;;  %v3057_v55 = vld [vmem:[#allocation13 + $0x308] ss:$16 sps:$4 sm:$0xff]  }
 0x2e8   :  { %1918 = vmatprep.subr.bf16.mxu0 %v2978_v57  ;;  %1959 = vmatprep.subr.bf16.mxu1 %v2981_v58  ;;  %v3060_v56 = vld [vmem:[#allocation14 + $0x78] sm:$0xff]   ;;  %v3062_v58 = vld [vmem:[#allocation14 + $0x70] sm:$0xff]  }
 0x2e9   :  { %v3061_v57 = vld [vmem:[#allocation14 + $0x38] sm:$0xff]  }
 0x2eb   :  { %1919 = vmatpush1.bf16.msra.mxu0 %v2976_v59  ;;  %1960 = vmatpush1.bf16.msra.mxu1 %v2979_v60  ;;  %v3063_v59 = vld [vmem:[#allocation14 + $0x30] sm:$0xff]   ;;  %v3064_v60 = vld [vmem:[#allocation14 + $0x68] sm:$0xff]  }
 0x2ec   :  { %1920 = vmatprep.subr.bf16.mxu0 %v2984_v61  ;;  %1961 = vmatprep.subr.bf16.mxu1 %v2987_v62  ;;  %v3065_v61 = vld [vmem:[#allocation14 + $0x28] sm:$0xff]   ;;  %v3066_v62 = vld [vmem:[#allocation14 + $0x60] sm:$0xff]  }
 0x2ef   :  { %1921 = vmatpush1.bf16.msra.mxu0 %v2982_v63  ;;  %1962 = vmatpush1.bf16.msra.mxu1 %v2985_v0  ;;  %v3067_v63 = vld [vmem:[#allocation14 + $0x20] sm:$0xff]   ;;  %v3068_v0 = vld [vmem:[#allocation14 + $0x58] sm:$0xff]  }
 0x2f0   :  { %1922 = vmatprep.subr.bf16.mxu0 %v2990_v1  ;;  %1963 = vmatprep.subr.bf16.mxu1 %v2993_v2  ;;  %v3069_v1 = vld [vmem:[#allocation14 + $0x18] sm:$0xff]   ;;  %v3070_v2 = vld [vmem:[#allocation14 + $0x50] sm:$0xff]  }
 0x2f3   :  { %1923 = vmatpush1.bf16.msra.mxu0 %v2988_v3  ;;  %1964 = vmatpush1.bf16.msra.mxu1 %v2991_v4  ;;  %v3073_v3 = vld [vmem:[#allocation14 + $0x8] sm:$0xff]   ;;  %v3074_v4 = vld [vmem:[#allocation14 + $0x40] sm:$0xff]  }
 0x2f4   :  { %1924 = vmatprep.subr.bf16.mxu0 %v2996_v5  ;;  %1965 = vmatprep.subr.bf16.mxu1 %v2999_v6  ;;  %v3075_v5 = vld [vmem:[#allocation14] sm:$0xff]   ;;  %v3076_v6 = vld [vmem:[#allocation14 + $0xf8] sm:$0xff]  }
 0x2f7   :  { %1925 = vmatpush1.bf16.msra.mxu0 %v2994_v7  ;;  %1966 = vmatpush1.bf16.msra.mxu1 %v2997_v8  ;;  %v1170_v7 = vld [vmem:[%s3444_s8] sm:$0xf] }
 0x2f8   :  { %1926 = vmatprep.subr.bf16.mxu0 %v3002_v9  ;;  %1967 = vmatprep.subr.bf16.mxu1 %v3005_v10  ;;  %v1175_v8 = vrot.slane %v1170_v7, %v3393_v17  ;;  %v1179_v9 = vrot.slane %v1170_v7, %v3396_v19  ;;  %v3078_v17 = vld [vmem:[#allocation14 + $0xf0] sm:$0xff]  }
 0x2f9   :  { %v3079_v19 = vld [vmem:[#allocation14 + $0xb0] sm:$0xff]  }
 0x2fb   :  { %1927 = vmatpush1.bf16.msra.mxu0 %v3000_v11  ;;  %1968 = vmatpush1.bf16.msra.mxu1 %v3003_v12 }
 0x2fc   :  { %1928 = vmatprep.subr.bf16.mxu0 %v3008_v13  ;;  %1969 = vmatprep.subr.bf16.mxu1 %v3011_v14 }
 0x2ff   :  { %1929 = vmatpush1.bf16.msra.mxu0 %v3006_v15  ;;  %1970 = vmatpush1.bf16.msra.mxu1 %v3009_v18 }
 0x300   :  { %1930 = vmatprep.subr.bf16.mxu0 %v3014_v20  ;;  %1971 = vmatprep.subr.bf16.mxu1 %v3017_v21 }
 0x303   :  { %1931 = vmatpush2.bf16.msra.mxu0 %v3012_v22  ;;  %1972 = vmatpush2.bf16.msra.mxu1 %v3015_v23 }
 0x304   :  { %1932 = vmatprep.subr.bf16.mxu0 %v3020_v25  ;;  %1973 = vmatprep.subr.bf16.mxu1 %v3023_v27 }
 0x307   :  { %1933 = vmatpush2.bf16.msra.mxu0 %v3018_v28  ;;  %1974 = vmatpush2.bf16.msra.mxu1 %v3021_v29 }
 0x308   :  { %1934 = vmatprep.subr.bf16.mxu0 %v3026_v30  ;;  %1975 = vmatprep.subr.bf16.mxu1 %v3029_v31  ;;  %v3077_v30 = vld [vmem:[#allocation14 + $0xb8] sm:$0xff]  }
 0x30b   :  { %1935 = vmatpush2.bf16.msra.mxu0 %v3024_v32  ;;  %1976 = vmatpush2.bf16.msra.mxu1 %v3027_v33  ;;  %v3080_v32 = vld [vmem:[#allocation14 + $0xe8] sm:$0xff]  }
 0x30c   :  { %1936 = vmatprep.subr.bf16.mxu0 %v3032_v34  ;;  %1977 = vmatprep.subr.bf16.mxu1 %v3035_v35  ;;  %v3081_v33 = vld [vmem:[#allocation14 + $0xa8] sm:$0xff]   ;;  %v3082_v34 = vld [vmem:[#allocation14 + $0xe0] sm:$0xff]  }
 0x30d   :  { %v3083_v35 = vld [vmem:[#allocation14 + $0xa0] sm:$0xff]  }
 0x30f   :  { %1937 = vmatpush2.bf16.msra.mxu0 %v3030_v36  ;;  %1978 = vmatpush2.bf16.msra.mxu1 %v3033_v37  ;;  %v3084_v36 = vld [vmem:[#allocation14 + $0xd8] sm:$0xff]  }
 0x310   :  { %1938 = vmatprep.subr.bf16.mxu0 %v3038_v38  ;;  %1979 = vmatprep.subr.bf16.mxu1 %v3041_v39  ;;  %v3085_v37 = vld [vmem:[#allocation14 + $0x98] sm:$0xff]   ;;  %v3086_v38 = vld [vmem:[#allocation14 + $0xd0] sm:$0xff]  }
 0x311   :  { %v3087_v39 = vld [vmem:[#allocation14 + $0x90] sm:$0xff]  }
 0x313   :  { %1939 = vmatpush2.bf16.msra.mxu0 %v3036_v40  ;;  %1980 = vmatpush2.bf16.msra.mxu1 %v3039_v41  ;;  %v3088_v40 = vld [vmem:[#allocation14 + $0xc8] sm:$0xff]  }
 0x314   :  { %1940 = vmatprep.subr.bf16.mxu0 %v3044_v42  ;;  %1981 = vmatprep.subr.bf16.mxu1 %v3047_v43  ;;  %v3089_v41 = vld [vmem:[#allocation14 + $0x88] sm:$0xff]   ;;  %v3090_v42 = vld [vmem:[#allocation14 + $0xc0] sm:$0xff]  }
 0x315   :  { %v3091_v43 = vld [vmem:[#allocation14 + $0x80] sm:$0xff]  }
 0x317   :  { %1941 = vmatpush2.bf16.msra.mxu0 %v3042_v44  ;;  %1982 = vmatpush2.bf16.msra.mxu1 %v3045_v45  ;;  %v1183_v44 = vrot.slane %v1170_v7, %v622_v24  ;;  %v1187_v45 = vrot.slane %v1170_v7, %v626_v26 }
 0x318   :  { %1942 = vmatprep.subr.bf16.mxu0 %v3050_v46  ;;  %1983 = vmatprep.subr.bf16.mxu1 %v3053_v47 }
 0x31b   :  { %1943 = vmatpush2.bf16.msra.mxu0 %v3048_v48  ;;  %1984 = vmatpush2.bf16.msra.mxu1 %v3051_v49 }
 0x31c   :  { %1944 = vmatprep.subr.bf16.mxu0 %v3056_v50  ;;  %1985 = vmatprep.subr.bf16.mxu1 %v3059_v53 }
 0x31f   :  { %1945 = vmatpush2.bf16.msra.mxu0 %v3054_v54  ;;  %1986 = vmatpush2.bf16.msra.mxu1 %v3057_v55 }
 0x320   :  { %2640 = vmatprep.subr.bf16.mxu0 %v3060_v56 }
 0x322   :  { %1947 = vmatmul.mubr.bf16.vlgmr.msra.gmra.mxu0 %v3413_v51  ;;  %1988 = vmatmul.mubr.bf16.vlgmr.msra.gmra.mxu1 %v3415_v52  ;;  %v3071_v51 = vld [vmem:[#allocation14 + $0x10] sm:$0xff]   ;;  %v3072_v52 = vld [vmem:[#allocation14 + $0x48] sm:$0xff]  }
 0x323   :  { %2641 = vmatpush3.bf16.msra.mxu0 %v3061_v57 }
 0x324   :  { %2642 = vmatprep.subr.bf16.mxu0 %v3062_v58 }
 0x327   :  { %2643 = vmatpush3.bf16.msra.mxu0 %v3063_v59 }
 0x328   :  { %2644 = vmatprep.subr.bf16.mxu0 %v3064_v60 }
 0x32b   :  { %2645 = vmatpush3.bf16.msra.mxu0 %v3065_v61 }
 0x32c   :  { %2646 = vmatprep.subr.bf16.mxu0 %v3066_v62 }
 0x32f   :  { %2647 = vmatpush3.bf16.msra.mxu0 %v3067_v63 }
 0x330   :  { %2648 = vmatprep.subr.bf16.mxu0 %v3068_v0 }
 0x333   :  { %2649 = vmatpush3.bf16.msra.mxu0 %v3069_v1 }
 0x334   :  { %2650 = vmatprep.subr.bf16.mxu0 %v3070_v2  ;;  %v2607_v2 = vld [vmem:[%s3446_s10] ss:$0 sm:$0xff] }
 0x337   :  { %2651 = vmatpush3.bf16.msra.mxu0 %v3071_v51 }
 0x338   :  { %2652 = vmatprep.subr.bf16.mxu0 %v3072_v52 }
 0x33b   :  { %2653 = vmatpush3.bf16.msra.mxu0 %v3073_v3 }
 0x33c   :  { %2654 = vmatprep.subr.bf16.mxu0 %v3074_v4 }
 0x33f   :  { %2655 = vmatpush3.bf16.msra.mxu0 %v3075_v5 }
 0x340   :  { %2662 = vmatprep.subr.bf16.mxu0 %v3076_v6 }
 0x3a2   :  { %v1866_v10 = vpop.f32.mrf.mxu0  ;;  %v1907_v11 = vpop.f32.mrf.mxu1 }
 0x3a3   :  { %v1867_v12 = vadd.f32 %v1866_v10, %v1175_v8 }
 0x3a4   :  { %v1868_v13 = vpop.f32.mrf.mxu0  ;;  %v1909_v14 = vpop.f32.mrf.mxu1 }
 0x3a5   :  { %v1908_v15 = vadd.f32 %v1907_v11, %v1867_v12  ;;  %v1869_v18 = vadd.f32 %v1868_v13, %v1179_v9 }
 0x3a6   :  { %v1870_v20 = vpop.f32.mrf.mxu0  ;;  %v1911_v21 = vpop.f32.mrf.mxu1 }
 0x3a7   :  { %v1910_v22 = vadd.f32 %v1909_v14, %v1869_v18  ;;  %v1996_v23 = vmax.f32 %v1908_v15, 0.0 }
 0x3a8   :  { %v1871_v25 = vpop.f32.mrf.mxu0  ;;  %v1912_v27 = vpop.f32.mrf.mxu1 }
 0x3a9   :  { %v1997_v28 = vmax.f32 %v1910_v22, 0.0  ;;  %v2000_v31 = vpack.c.bf16 %v1996_v23, %v1996_v23 }
 0x3ab   :  { %v2001_v29 = vpack.c.bf16 %v1997_v28, %v1997_v28 }
 0x3ad   :  { %2299 = vmatprep.mubr.bf16.mxu0 %v2001_v29 }
 0x3ae   :  { %2300 = vmatmul.mubr.bf16.vlgmr.msra.gmra.mxu0 %v2000_v31 }
 0x3af   :  { %2663 = vmatpush3.bf16.msra.mxu0 %v3077_v30 }
 0x3b0   :  { %2664 = vmatprep.subr.bf16.mxu0 %v3078_v17 }
 0x3b3   :  { %2665 = vmatpush3.bf16.msra.mxu0 %v3079_v19 }
 0x3b4   :  { %2666 = vmatprep.subr.bf16.mxu0 %v3080_v32 }
 0x3b7   :  { %2667 = vmatpush3.bf16.msra.mxu0 %v3081_v33 }
 0x3b8   :  { %2668 = vmatprep.subr.bf16.mxu0 %v3082_v34 }
 0x3bb   :  { %2669 = vmatpush3.bf16.msra.mxu0 %v3083_v35 }
 0x3bc   :  { %2670 = vmatprep.subr.bf16.mxu0 %v3084_v36 }
 0x3bf   :  { %2671 = vmatpush3.bf16.msra.mxu0 %v3085_v37 }
 0x3c0   :  { %2672 = vmatprep.subr.bf16.mxu0 %v3086_v38 }
 0x3c3   :  { %2673 = vmatpush3.bf16.msra.mxu0 %v3087_v39 }
 0x3c4   :  { %2674 = vmatprep.subr.bf16.mxu0 %v3088_v40 }
 0x3c7   :  { %2675 = vmatpush3.bf16.msra.mxu0 %v3089_v41 }
 0x3c8   :  { %2676 = vmatprep.subr.bf16.mxu0 %v3090_v42 }
 0x3cb   :  { %2677 = vmatpush3.bf16.msra.mxu0 %v3091_v43 }
 0x3e2   :  { %v1948_v46 = vpop.f32.mrf.mxu0  ;;  %v1989_v47 = vpop.f32.mrf.mxu1 }
 0x3e3   :  { %v1949_v48 = vadd.f32 %v1948_v46, %v1183_v44 }
 0x3e4   :  { %v1950_v49 = vpop.f32.mrf.mxu0  ;;  %v1991_v50 = vpop.f32.mrf.mxu1 }
 0x3e5   :  { %v1990_v53 = vadd.f32 %v1989_v47, %v1949_v48  ;;  %v1951_v54 = vadd.f32 %v1950_v49, %v1187_v45 }
 0x3e6   :  { %v1952_v55 = vpop.f32.mrf.mxu0  ;;  %v1993_v56 = vpop.f32.mrf.mxu1 }
 0x3e7   :  { %v1992_v57 = vadd.f32 %v1991_v50, %v1951_v54  ;;  %v1998_v58 = vmax.f32 %v1990_v53, 0.0 }
 0x3e8   :  { %v1953_v59 = vpop.f32.mrf.mxu0  ;;  %v1994_v60 = vpop.f32.mrf.mxu1 }
 0x3e9   :  { %v1999_v61 = vmax.f32 %v1992_v57, 0.0  ;;  %v2002_v63 = vpack.c.bf16 %v1998_v58, %v1998_v58 }
 0x3eb   :  { %v2003_v62 = vpack.c.bf16 %v1999_v61, %v1999_v61 }
 0x3ed   :  { %2339 = vmatprep.mubr.bf16.mxu0 %v2003_v62 }
 0x3ee   :  { %2340 = vmatmul.mubr.bf16.vlgmr.msra.gmra.mxu0 %v2002_v63 }
 0x46e   :  { %v2656_v16 = vpop.f32.mrf.mxu0 }
 0x470   :  { %v2657_v24 = vpop.f32.mrf.mxu0 }
 0x471   :  { %v2658_v1 = vadd.f32 %v2657_v24, %v2656_v16 }
 0x472   :  { %v2659_v26 = vpop.f32.mrf.mxu0 }
 0x473   :  { %v2302_v3 = vadd.f32 %v2658_v1, %v2607_v2 }
 0x474   :  { %v2660_v0 = vpop.f32.mrf.mxu0 }
 0x4ae   :  { %v2678_v51 = vpop.f32.mrf.mxu0 }
 0x4b0   :  { %v2679_v52 = vpop.f32.mrf.mxu0 }
 0x4b1   :  { %v2680_v4 = vadd.f32 %v2679_v52, %v2678_v51 }
 0x4b2   :  { %v2681_v5 = vpop.f32.mrf.mxu0 }
 0x4b3   :  { %v2342_v6 = vadd.f32 %v2680_v4, %v2302_v3 }
 0x4b4   :  { %v2682_v7 = vpop.f32.mrf.mxu0 }
 0x4b5   :  { %2347 = vst [vmem:[#allocation16] sm:$0xff] %v2342_v6 }
 0x4b6   :  { %3263 = shalt.err (!%p3260_p2)
}
 0x4b7   :  { %2357 = dma.vmem_to_hbm [thread:$0]  %s2355_s20, 128, %s3447_s11, [#allocation4]  }
 0x4b8   :  { %3282 = dma.done.wait [#allocation4], 128  }
 0x4b9   :  { %3283 = vsyncadd [#allocation4], 4294967168 }
 0x4ba   :  { %2361 = vsyncpa [#allocation3], 1 }
 0x4bb   :  { %2362 = vsyncpa [#allocation6], 1 }
 0x4bc   :  { %2363 = vsyncpa [#allocation9], 1 }
 0x4bd   :  { %2364 = vsyncpa [#allocation12], 1 }
 0x4be   :  { %2365 = vsyncpa [#allocation15], 1 }
 0x4bf   :  { %2366 = vsyncpa [#allocation4], 1 }

</bundles_post_ra>
